<compile_context>
chip_gen: v7x
topology: tpu7x:2x2x1
jax: 0.10.0
libtpu: 0.0.40
codegen_flags: <defaults>
</compile_context>

<pallas_src>
import jax
import jax.numpy as jnp
import numpy as np
from jax.experimental import pallas as pl
from jax.experimental.pallas import tpu as pltpu


# ---------------------------------------------------------------------------
# Pallas kernel: one batch tile (batch_tile items x A actions) per grid step
# ---------------------------------------------------------------------------
def dueling_dqn_kernel(
    x_ref,        # (BT, A, D)   padded state rows (state | action sub-vector)
    keep_ref,     # (BT, A)      1.0 where the action slot is valid, 0.0 pad
    wcat_ref,     # (D, 2H)      block-diag [ws 0; 0 wa]    (fused first layer)
    wh2_ref,      # (2H, 2H)     [[wv1, wad1_top], [0, wad1_bot]] (fused hidden)
    wi1_ref,      # (H, IH)      intent hidden
    smalls_ref,   # (8, SW)      packed biases / (.,1) weight rows (see wrapper)
    q_ref,        # (BT, A)      output Q values
    intent_ref,   # (BT, 1)      output intent logits
):
    f32 = jnp.float32
    bt, a, d = x_ref.shape
    h2w = wh2_ref.shape[0]       # 2H
    h = h2w // 2
    ih = wi1_ref.shape[1]
    rows = bt * a

    x2 = x_ref[...].reshape(rows, d)       # merge leading dims (layout-preserving)
    keep2 = keep_ref[...]                  # (bt, a)
    keep3 = keep2[:, :, None]              # (bt, a, 1)

    # unpack small params (static slices)
    b_cat = smalls_ref[0:1, :h2w]          # (1, 2H) = [bs | ba]
    b_h2 = smalls_ref[1:2, :h2w]           # (1, 2H) = [bv1 | bad1]
    wv2r = smalls_ref[2:3, :h]             # (1, H)   value-out weight row
    wad2r = smalls_ref[3:4, :h]            # (1, H)   advantage-out weight row
    bi1 = smalls_ref[4:5, :ih]             # (1, IH)
    wi2r = smalls_ref[5:6, :ih]            # (1, IH)  intent-out weight row
    bv2 = smalls_ref[6:7, 0:1]             # (1, 1)
    bad2 = smalls_ref[6:7, 1:2]            # (1, 1)
    bi2 = smalls_ref[6:7, 2:3]             # (1, 1)

    def mm(x, w_ref):
        return jnp.dot(x, w_ref[...], preferred_element_type=f32)

    # fused shared|action first layer: columns [:H] = shared, [H:] = action.
    h1 = jnp.maximum(mm(x2, wcat_ref) + b_cat, 0.0)          # (rows, 2H)
    h1m3 = h1.reshape(bt, a, h2w) * keep3                    # mask padded rows
    h1m = h1m3.reshape(rows, h2w)                            # == adv_in (no concat)
    shared3 = h1m3[:, :, :h]                                 # (bt, a, H) masked shared

    # fused value-hidden | advantage-hidden layer (one K=N=256 matmul)
    hid = jnp.maximum(mm(h1m, wh2_ref) + b_h2, 0.0)          # (rows, 2H)
    hid3 = hid.reshape(bt, a, h2w)
    valh3 = hid3[:, :, :h]                                   # (bt, a, H)
    advh3 = hid3[:, :, h:]                                   # (bt, a, H)

    # N=1 projections as VPU mul + lane reduce
    val3 = jnp.sum(valh3 * wv2r, axis=-1) + bv2                       # (bt, a)
    adv3 = (jnp.sum(advh3 * wad2r, axis=-1) + bad2) * keep2           # (bt, a)

    # dueling combine: Q = V + A - mean(A over valid actions)
    nvalid = jnp.sum(keep2, axis=-1, keepdims=True)                   # (bt, 1)
    adv_mean = jnp.sum(adv3, axis=-1, keepdims=True) / jnp.maximum(nvalid, 1.0)
    q = val3 + adv3 - adv_mean
    q_ref[...] = jnp.where(keep2 > 0.0, q, -jnp.inf)

    # intent head: max-pool masked shared features over actions, Linear(H,IH),
    # (Dropout identity at eval), then IH->1 as VPU reduce.
    sh_max = jnp.max(shared3, axis=1)                                 # (bt, H)
    ihid = mm(sh_max, wi1_ref) + bi1                                  # (bt, IH)
    intent_ref[...] = jnp.sum(ihid * wi2r, axis=-1, keepdims=True) + bi2


# ---------------------------------------------------------------------------
# Wrapper
# ---------------------------------------------------------------------------
def dueling_dqn_forward(padded_inputs, num_actions, params, state_input_size,
                        batch_tile=16):
    B, A, D = padded_inputs.shape
    S = state_input_size
    H = params["wv1"].shape[0]
    IH = params["wi1"].shape[1]

    bt = int(batch_tile)
    B_pad = ((B + bt - 1) // bt) * bt
    if B_pad != B:
        padded_inputs = jnp.pad(padded_inputs, ((0, B_pad - B), (0, 0), (0, 0)))
        num_actions = jnp.pad(num_actions, (0, B_pad - B))

    # keep mask: 1.0 where the action slot is valid
    keep2 = (jnp.arange(A)[None, :] < num_actions[:, None]).astype(jnp.float32)

    # fused block-diagonal first-layer weight: [ws 0; 0 wa]
    wcat = jnp.zeros((D, 2 * H), jnp.float32)
    wcat = wcat.at[:S, :H].set(params["ws"]).at[S:, H:].set(params["wa"])

    # fused second-layer weight: columns [:H] = value hidden (input = shared
    # half only -> bottom H rows zero), columns [H:] = advantage hidden
    # (input = full 2H concat).
    wh2 = jnp.zeros((2 * H, 2 * H), jnp.float32)
    wh2 = wh2.at[:H, :H].set(params["wv1"]).at[:, H:].set(params["wad1"])

    # pack all small vectors / scalars into one padded (8, SW) array
    SW = int(np.ceil(max(2 * H, IH, 128) / 128) * 128)
    smalls = jnp.zeros((8, SW), jnp.float32)
    smalls = smalls.at[0, :H].set(params["bs"][0]).at[0, H:2 * H].set(params["ba"][0])
    smalls = smalls.at[1, :H].set(params["bv1"][0]).at[1, H:2 * H].set(params["bad1"][0])
    smalls = smalls.at[2, :H].set(params["wv2"][:, 0])
    smalls = smalls.at[3, :H].set(params["wad2"][:, 0])
    smalls = smalls.at[4, :IH].set(params["bi1"][0])
    smalls = smalls.at[5, :IH].set(params["wi2"][:, 0])
    smalls = smalls.at[6, 0].set(params["bv2"][0, 0])
    smalls = smalls.at[6, 1].set(params["bad2"][0, 0])
    smalls = smalls.at[6, 2].set(params["bi2"][0, 0])

    grid = (B_pad // bt,)

    in_specs = [
        pl.BlockSpec((bt, A, D), lambda i: (i, 0, 0)),
        pl.BlockSpec((bt, A), lambda i: (i, 0)),
        pl.BlockSpec(wcat.shape, lambda i: (0, 0)),
        pl.BlockSpec(wh2.shape, lambda i: (0, 0)),
        pl.BlockSpec(params["wi1"].shape, lambda i: (0, 0)),
        pl.BlockSpec(smalls.shape, lambda i: (0, 0)),
    ]
    out_specs = (
        pl.BlockSpec((bt, A), lambda i: (i, 0)),
        pl.BlockSpec((bt, 1), lambda i: (i, 0)),
    )

    q, intent = pl.pallas_call(
        dueling_dqn_kernel,
        out_shape=(
            jax.ShapeDtypeStruct((B_pad, A), jnp.float32),
            jax.ShapeDtypeStruct((B_pad, 1), jnp.float32),
        ),
        grid_spec=pltpu.PrefetchScalarGridSpec(
            num_scalar_prefetch=0,
            grid=grid,
            in_specs=in_specs,
            out_specs=out_specs,
        ),
        compiler_params=pltpu.CompilerParams(
            dimension_semantics=("parallel",),
        ),
    )(padded_inputs, keep2, wcat, wh2, params["wi1"], smalls)

    return q[:B], intent[:B]


# ---------------------------------------------------------------------------
# Pure-JAX reference (mirrors the PyTorch forward exactly)
# ---------------------------------------------------------------------------
def reference_forward(padded_inputs, num_actions, params, state_input_size):
    B, A, D = padded_inputs.shape
    S = state_input_size
    mask = ~(jnp.arange(A)[None, :] < num_actions[:, None])
    keep = (~mask).astype(jnp.float32)[..., None]

    xs = padded_inputs[:, :, :S]
    xa = padded_inputs[:, :, S:]

    shared = jnp.maximum(xs @ params["ws"] + params["bs"], 0.0) * keep
    action = jnp.maximum(xa @ params["wa"] + params["ba"], 0.0) * keep
    valh = jnp.maximum(shared @ params["wv1"] + params["bv1"], 0.0) * keep
    val = (valh @ params["wv2"] + params["bv2"]) * keep
    adv_in = jnp.concatenate([shared, action], axis=-1)
    advh = jnp.maximum(adv_in @ params["wad1"] + params["bad1"], 0.0) * keep
    adv = (advh @ params["wad2"] + params["bad2"]) * keep

    adv_flat = adv[..., 0]
    adv_mean = adv_flat.sum(1) / num_actions.astype(jnp.float32)
    result = val[..., 0] + adv_flat - adv_mean[:, None]
    result = jnp.where(mask, -jnp.inf, result)

    intent_in = shared.max(axis=1)
    intent = (intent_in @ params["wi1"] + params["bi1"]) @ params["wi2"] + params["bi2"]
    return result, intent


# ---------------------------------------------------------------------------
# Deterministic parameter init (PyTorch nn.Linear default: U(-k, k), k=1/sqrt(fan_in))
# ---------------------------------------------------------------------------
def make_linear(key, fan_in, fan_out):
    kw, kb = jax.random.split(key)
    k = 1.0 / np.sqrt(fan_in)
    w = jax.random.uniform(kw, (fan_in, fan_out), jnp.float32, -k, k)
    b = jax.random.uniform(kb, (1, fan_out), jnp.float32, -k, k)
    return w, b


def init_params(key, S, ACT, H, IH):
    keys = jax.random.split(key, 8)
    p = {}
    p["ws"], p["bs"] = make_linear(keys[0], S, H)          # shared layer
    p["wa"], p["ba"] = make_linear(keys[1], ACT, H)        # action-input layer
    p["wv1"], p["bv1"] = make_linear(keys[2], H, H)        # value hidden
    p["wv2"], p["bv2"] = make_linear(keys[3], H, 1)        # value out
    p["wad1"], p["bad1"] = make_linear(keys[4], 2 * H, H)  # advantage hidden
    p["wad2"], p["bad2"] = make_linear(keys[5], H, 1)      # advantage out (action_dim=1)
    p["wi1"], p["bi1"] = make_linear(keys[6], H, IH)       # intent head hidden
    p["wi2"], p["bi2"] = make_linear(keys[7], IH, 1)       # intent head out
    return p


# ---------------------------------------------------------------------------
if __name__ == "__main__":
    # batch=32, max_actions=8, state split 32 (state) + 16 (action sub-vector),
    # shared/value/advantage hidden = 128, intent hidden = 256.
    B, A = 32, 8
    S, ACT = 32, 16
    H, IH = 128, 256
    D = S + ACT

    root = jax.random.PRNGKey(0)
    k_x, k_p, k_n = jax.random.split(root, 3)

    params = init_params(k_p, S, ACT, H, IH)

    num_actions = jax.random.randint(k_n, (B,), 1, A + 1).astype(jnp.int32)
    padded_inputs = jax.random.normal(k_x, (B, A, D), jnp.float32)
    # zero out padding rows (pad_packed_sequence semantics); masked anyway
    valid = (jnp.arange(A)[None, :] < num_actions[:, None]).astype(jnp.float32)
    padded_inputs = padded_inputs * valid[..., None]

    q, intent = dueling_dqn_forward(padded_inputs, num_actions, params, S, batch_tile=16)
    q, intent = jax.block_until_ready((q, intent))

    q_ref, intent_ref = reference_forward(padded_inputs, num_actions, params, S)

    q_np, q_ref_np = np.asarray(q), np.asarray(q_ref)
    finite = np.isfinite(q_ref_np)
    assert np.array_equal(np.isneginf(q_np), np.isneginf(q_ref_np)), "padding -inf mismatch"
    assert np.allclose(q_np[finite], q_ref_np[finite], rtol=1e-4, atol=1e-4), "q mismatch"
    assert np.allclose(np.asarray(intent), np.asarray(intent_ref), rtol=1e-4, atol=1e-4), \
        "intent logits mismatch"

    print("KERNEL_OK")
</pallas_src>

<mosaic_0001>
module attributes {stable_mosaic.version = 11 : i64} {
  func.func @dueling_dqn_kernel(%arg0: i32, %arg1: memref<16x8x48xf32, #tpu.memory_space<vmem>>, %arg2: memref<16x8xf32, #tpu.memory_space<vmem>>, %arg3: memref<48x256xf32, #tpu.memory_space<vmem>>, %arg4: memref<256x256xf32, #tpu.memory_space<vmem>>, %arg5: memref<128x256xf32, #tpu.memory_space<vmem>>, %arg6: memref<8x256xf32, #tpu.memory_space<vmem>>, %arg7: memref<16x8xf32, #tpu.memory_space<vmem>>, %arg8: memref<16x1xf32, #tpu.memory_space<vmem>>) attributes {dimension_semantics = [#tpu.dimension_semantics<parallel>], iteration_bounds = array<i64: 2>, scalar_prefetch = 0 : i64, scratch_operands = 0 : i64, tpu.core_type = #tpu.core_type<tc>, window_params = [{transform_indices = @transform_0, window_bounds = array<i64: 16, 8, 48>}, {transform_indices = @transform_1, window_bounds = array<i64: 16, 8>}, {pipeline_mode = #tpu.pipeline_mode<synchronous>, transform_indices = @transform_2, window_bounds = array<i64: 48, 256>}, {pipeline_mode = #tpu.pipeline_mode<synchronous>, transform_indices = @transform_3, window_bounds = array<i64: 256, 256>}, {pipeline_mode = #tpu.pipeline_mode<synchronous>, transform_indices = @transform_4, window_bounds = array<i64: 128, 256>}, {pipeline_mode = #tpu.pipeline_mode<synchronous>, transform_indices = @transform_5, window_bounds = array<i64: 8, 256>}, {transform_indices = @transform_6, window_bounds = array<i64: 16, 8>}, {transform_indices = @transform_7, window_bounds = array<i64: 16, 1>}]} {
    %c0 = arith.constant 0 : index
    %c0_0 = arith.constant 0 : index
    %c0_1 = arith.constant 0 : index
    %0 = vector.load %arg1[%c0, %c0_0, %c0_1] : memref<16x8x48xf32, #tpu.memory_space<vmem>>, vector<16x8x48xf32>
    %1 = vector.shape_cast %0 : vector<16x8x48xf32> to vector<128x48xf32>
    %c0_2 = arith.constant 0 : index
    %c0_3 = arith.constant 0 : index
    %2 = vector.load %arg2[%c0_2, %c0_3] : memref<16x8xf32, #tpu.memory_space<vmem>>, vector<16x8xf32>
    %3 = vector.shape_cast %2 : vector<16x8xf32> to vector<16x8x1xf32>
    %c0_4 = arith.constant 0 : index
    %c0_5 = arith.constant 0 : index
    %4 = vector.load %arg6[%c0_4, %c0_5] : memref<8x256xf32, #tpu.memory_space<vmem>>, vector<1x256xf32>
    %c1 = arith.constant 1 : index
    %c0_6 = arith.constant 0 : index
    %5 = vector.load %arg6[%c1, %c0_6] : memref<8x256xf32, #tpu.memory_space<vmem>>, vector<1x256xf32>
    %c2 = arith.constant 2 : index
    %c0_7 = arith.constant 0 : index
    %6 = vector.load %arg6[%c2, %c0_7] : memref<8x256xf32, #tpu.memory_space<vmem>>, vector<1x128xf32>
    %c3 = arith.constant 3 : index
    %c0_8 = arith.constant 0 : index
    %7 = vector.load %arg6[%c3, %c0_8] : memref<8x256xf32, #tpu.memory_space<vmem>>, vector<1x128xf32>
    %c4 = arith.constant 4 : index
    %c0_9 = arith.constant 0 : index
    %8 = vector.load %arg6[%c4, %c0_9] : memref<8x256xf32, #tpu.memory_space<vmem>>, vector<1x256xf32>
    %c5 = arith.constant 5 : index
    %c0_10 = arith.constant 0 : index
    %9 = vector.load %arg6[%c5, %c0_10] : memref<8x256xf32, #tpu.memory_space<vmem>>, vector<1x256xf32>
    %c6 = arith.constant 6 : index
    %c0_11 = arith.constant 0 : index
    %10 = vector.load %arg6[%c6, %c0_11] : memref<8x256xf32, #tpu.memory_space<vmem>>, vector<1x1xf32>
    %c6_12 = arith.constant 6 : index
    %c1_13 = arith.constant 1 : index
    %11 = vector.load %arg6[%c6_12, %c1_13] : memref<8x256xf32, #tpu.memory_space<vmem>>, vector<1x1xf32>
    %c6_14 = arith.constant 6 : index
    %c2_15 = arith.constant 2 : index
    %12 = vector.load %arg6[%c6_14, %c2_15] : memref<8x256xf32, #tpu.memory_space<vmem>>, vector<1x1xf32>
    %c0_16 = arith.constant 0 : index
    %c0_17 = arith.constant 0 : index
    %13 = vector.load %arg3[%c0_16, %c0_17] : memref<48x256xf32, #tpu.memory_space<vmem>>, vector<48x256xf32>
    %cst = arith.constant dense<0.000000e+00> : vector<128x256xf32>
    %14 = tpu.matmul %1, %13, %cst {dimension_numbers = #tpu.dot_dimension_numbers<[1], [0], [0], [1], [0, 0, 1, 1], [], []>} : vector<128x48xf32>, vector<48x256xf32>, vector<128x256xf32> -> vector<128x256xf32>
    %15 = vector.broadcast %4 : vector<1x256xf32> to vector<128x256xf32>
    %16 = arith.addf %14, %15 : vector<128x256xf32>
    %cst_18 = arith.constant 0.000000e+00 : f32
    %17 = vector.broadcast %cst_18 : f32 to vector<128x256xf32>
    %18 = arith.maximumf %16, %17 : vector<128x256xf32>
    %19 = vector.shape_cast %18 : vector<128x256xf32> to vector<16x8x256xf32>
    %20 = vector.broadcast %3 : vector<16x8x1xf32> to vector<16x8x256xf32>
    %21 = arith.mulf %19, %20 : vector<16x8x256xf32>
    %22 = vector.shape_cast %21 : vector<16x8x256xf32> to vector<128x256xf32>
    %23 = vector.extract_strided_slice %21 {offsets = [0, 0, 0], sizes = [16, 8, 128], strides = [1, 1, 1]} : vector<16x8x256xf32> to vector<16x8x128xf32>
    %c0_19 = arith.constant 0 : index
    %c0_20 = arith.constant 0 : index
    %24 = vector.load %arg4[%c0_19, %c0_20] : memref<256x256xf32, #tpu.memory_space<vmem>>, vector<256x256xf32>
    %cst_21 = arith.constant dense<0.000000e+00> : vector<128x256xf32>
    %25 = tpu.matmul %22, %24, %cst_21 {dimension_numbers = #tpu.dot_dimension_numbers<[1], [0], [0], [1], [0, 0, 1, 1], [], []>} : vector<128x256xf32>, vector<256x256xf32>, vector<128x256xf32> -> vector<128x256xf32>
    %26 = vector.broadcast %5 : vector<1x256xf32> to vector<128x256xf32>
    %27 = arith.addf %25, %26 : vector<128x256xf32>
    %cst_22 = arith.constant 0.000000e+00 : f32
    %28 = vector.broadcast %cst_22 : f32 to vector<128x256xf32>
    %29 = arith.maximumf %27, %28 : vector<128x256xf32>
    %30 = vector.shape_cast %29 : vector<128x256xf32> to vector<16x8x256xf32>
    %31 = vector.extract_strided_slice %30 {offsets = [0, 0, 0], sizes = [16, 8, 128], strides = [1, 1, 1]} : vector<16x8x256xf32> to vector<16x8x128xf32>
    %32 = vector.extract_strided_slice %30 {offsets = [0, 0, 128], sizes = [16, 8, 128], strides = [1, 1, 1]} : vector<16x8x256xf32> to vector<16x8x128xf32>
    %33 = vector.shape_cast %6 : vector<1x128xf32> to vector<1x1x128xf32>
    %34 = vector.broadcast %33 : vector<1x1x128xf32> to vector<16x8x128xf32>
    %35 = arith.mulf %31, %34 : vector<16x8x128xf32>
    %cst_23 = arith.constant dense<0.000000e+00> : vector<16x8xf32>
    %36 = vector.multi_reduction <add>, %35, %cst_23 [2] : vector<16x8x128xf32> to vector<16x8xf32>
    %37 = vector.broadcast %10 : vector<1x1xf32> to vector<16x8xf32>
    %38 = arith.addf %36, %37 : vector<16x8xf32>
    %39 = vector.shape_cast %7 : vector<1x128xf32> to vector<1x1x128xf32>
    %40 = vector.broadcast %39 : vector<1x1x128xf32> to vector<16x8x128xf32>
    %41 = arith.mulf %32, %40 : vector<16x8x128xf32>
    %cst_24 = arith.constant dense<0.000000e+00> : vector<16x8xf32>
    %42 = vector.multi_reduction <add>, %41, %cst_24 [2] : vector<16x8x128xf32> to vector<16x8xf32>
    %43 = vector.broadcast %11 : vector<1x1xf32> to vector<16x8xf32>
    %44 = arith.addf %42, %43 : vector<16x8xf32>
    %45 = arith.mulf %44, %2 : vector<16x8xf32>
    %cst_25 = arith.constant dense<0.000000e+00> : vector<16xf32>
    %46 = vector.multi_reduction <add>, %2, %cst_25 [1] : vector<16x8xf32> to vector<16xf32>
    %47 = vector.shape_cast %46 : vector<16xf32> to vector<16x1xf32>
    %cst_26 = arith.constant dense<0.000000e+00> : vector<16xf32>
    %48 = vector.multi_reduction <add>, %45, %cst_26 [1] : vector<16x8xf32> to vector<16xf32>
    %49 = vector.shape_cast %48 : vector<16xf32> to vector<16x1xf32>
    %cst_27 = arith.constant 1.000000e+00 : f32
    %50 = vector.broadcast %cst_27 : f32 to vector<16x1xf32>
    %51 = arith.maximumf %47, %50 : vector<16x1xf32>
    %52 = arith.divf %49, %51 : vector<16x1xf32>
    %53 = arith.addf %38, %45 : vector<16x8xf32>
    %54 = vector.broadcast %52 : vector<16x1xf32> to vector<16x8xf32>
    %55 = arith.subf %53, %54 : vector<16x8xf32>
    %cst_28 = arith.constant 0.000000e+00 : f32
    %56 = vector.broadcast %cst_28 : f32 to vector<16x8xf32>
    %57 = arith.cmpf ogt, %2, %56 : vector<16x8xf32>
    %cst_29 = arith.constant 0xFF800000 : f32
    %58 = vector.broadcast %cst_29 : f32 to vector<16x8xf32>
    %59 = arith.select %57, %55, %58 : vector<16x8xi1>, vector<16x8xf32>
    %c0_30 = arith.constant 0 : index
    %c0_31 = arith.constant 0 : index
    %60 = vector.load %arg7[%c0_30, %c0_31] : memref<16x8xf32, #tpu.memory_space<vmem>>, vector<16x8xf32>
    tpu.vector_store %arg7[%c0_30, %c0_31], %59 {strides = array<i32>} : memref<16x8xf32, #tpu.memory_space<vmem>>, vector<16x8xf32>,
    %cst_32 = arith.constant dense<0xFF800000> : vector<16x128xf32>
    %61 = vector.multi_reduction <maximumf>, %23, %cst_32 [1] : vector<16x8x128xf32> to vector<16x128xf32>
    %c0_33 = arith.constant 0 : index
    %c0_34 = arith.constant 0 : index
    %62 = vector.load %arg5[%c0_33, %c0_34] : memref<128x256xf32, #tpu.memory_space<vmem>>, vector<128x256xf32>
    %cst_35 = arith.constant dense<0.000000e+00> : vector<16x256xf32>
    %63 = tpu.matmul %61, %62, %cst_35 {dimension_numbers = #tpu.dot_dimension_numbers<[1], [0], [0], [1], [0, 0, 1, 1], [], []>} : vector<16x128xf32>, vector<128x256xf32>, vector<16x256xf32> -> vector<16x256xf32>
    %64 = vector.broadcast %8 : vector<1x256xf32> to vector<16x256xf32>
    %65 = arith.addf %63, %64 : vector<16x256xf32>
    %66 = vector.broadcast %9 : vector<1x256xf32> to vector<16x256xf32>
    %67 = arith.mulf %65, %66 : vector<16x256xf32>
    %cst_36 = arith.constant dense<0.000000e+00> : vector<16xf32>
    %68 = vector.multi_reduction <add>, %67, %cst_36 [1] : vector<16x256xf32> to vector<16xf32>
    %69 = vector.shape_cast %68 : vector<16xf32> to vector<16x1xf32>
    %70 = vector.broadcast %12 : vector<1x1xf32> to vector<16x1xf32>
    %71 = arith.addf %69, %70 : vector<16x1xf32>
    %c0_37 = arith.constant 0 : index
    %c0_38 = arith.constant 0 : index
    %72 = vector.load %arg8[%c0_37, %c0_38] : memref<16x1xf32, #tpu.memory_space<vmem>>, vector<16x1xf32>
    tpu.vector_store %arg8[%c0_37, %c0_38], %71 {strides = array<i32>} : memref<16x1xf32, #tpu.memory_space<vmem>>, vector<16x1xf32>,
    return
  }
  func.func @transform_0(%arg0: i32) -> (i32, i32, i32) {
    %c0_i32 = arith.constant 0 : i32
    %c0_i32_0 = arith.constant 0 : i32
    %c0_i32_1 = arith.constant 0 : i32
    return %arg0, %c0_i32, %c0_i32_0 : i32, i32, i32
  }
  func.func @transform_1(%arg0: i32) -> (i32, i32) {
    %c0_i32 = arith.constant 0 : i32
    %c0_i32_0 = arith.constant 0 : i32
    return %arg0, %c0_i32 : i32, i32
  }
  func.func @transform_2(%arg0: i32) -> (i32, i32) {
    %c0_i32 = arith.constant 0 : i32
    %c0_i32_0 = arith.constant 0 : i32
    %c0_i32_1 = arith.constant 0 : i32
    return %c0_i32, %c0_i32_0 : i32, i32
  }
  func.func @transform_3(%arg0: i32) -> (i32, i32) {
    %c0_i32 = arith.constant 0 : i32
    %c0_i32_0 = arith.constant 0 : i32
    %c0_i32_1 = arith.constant 0 : i32
    return %c0_i32, %c0_i32_0 : i32, i32
  }
  func.func @transform_4(%arg0: i32) -> (i32, i32) {
    %c0_i32 = arith.constant 0 : i32
    %c0_i32_0 = arith.constant 0 : i32
    %c0_i32_1 = arith.constant 0 : i32
    return %c0_i32, %c0_i32_0 : i32, i32
  }
  func.func @transform_5(%arg0: i32) -> (i32, i32) {
    %c0_i32 = arith.constant 0 : i32
    %c0_i32_0 = arith.constant 0 : i32
    %c0_i32_1 = arith.constant 0 : i32
    return %c0_i32, %c0_i32_0 : i32, i32
  }
  func.func @transform_6(%arg0: i32) -> (i32, i32) {
    %c0_i32 = arith.constant 0 : i32
    %c0_i32_0 = arith.constant 0 : i32
    return %arg0, %c0_i32 : i32, i32
  }
  func.func @transform_7(%arg0: i32) -> (i32, i32) {
    %c0_i32 = arith.constant 0 : i32
    %c0_i32_0 = arith.constant 0 : i32
    return %arg0, %c0_i32 : i32, i32
  }
}

</mosaic_0001>

<bundles_post_ra>
// kernel: tpu_custom_call.1
= control target key start
LH: loop header
LB: loop body
LE: loop exit
PB: predicated region body
PF: predicated region fallthrough
CT: control target
= control target key end

     0   :  { %13 = vsyncpa [#allocation3], 0  ;;  %s3481_s0 = inlined_call_operand.hbm [shape: f32[32,8,48], index: 0, kind: input, shape index: {}]   ;;  %s3482_s1 = inlined_call_operand.vmem [shape: f32[32,8], index: 1, kind: input, shape index: {}]   ;;  %s3483_s2 = inlined_call_operand.hbm [shape: f32[48,256], index: 2, kind: input, shape index: {}]   ;;  %s3484_s3 = inlined_call_operand.hbm [shape: f32[256,256], index: 3, kind: input, shape index: {}]   ;;  %s3485_s4 = inlined_call_operand.hbm [shape: f32[128,256], index: 4, kind: input, shape index: {}]   ;;  %s3486_s5 = inlined_call_operand.vmem [shape: f32[8,256], index: 5, kind: input, shape index: {}]   ;;  %s3487_s6 = inlined_call_operand.vmem [shape: f32[32,8], index: 6, kind: output, shape index: {0}]   ;;  %s3488_s7 = inlined_call_operand.vmem [shape: f32[32,1], index: 7, kind: output, shape index: {1}]  }
   0x1   :  { %15 = vsyncpa [#allocation3 + $0x1], 0 }
   0x2   :  { %16 = vsyncpa [#allocation5], 0 }
   0x3   :  { %17 = vsyncpa [#allocation8], 0  ;;  %s2678_s24 = smov 0   ;;  %s2680_s25 = smov 0  }
   0x4   :  { %s2682_s26 = smov 0   ;;  %s2684_s27 = smov 0  }
   0x5 LB: > { %s2229_s28 = sadd.s32 4294967295, %s2624_s27   ;;  %p43_p0 = scmp.ne.s32.totalorder %s2616_s25, %s2612_s24  ;;  %s2624_s27 = sphi %s2684_s27, %s3505_s27   ;;  %s2620_s26 = sphi %s2682_s26, %s3504_s26   ;;  %s2616_s25 = sphi %s2680_s25, %s3503_s25   ;;  %s2612_s24 = sphi %s2678_s24, %s3502_s24  }
   0x6   : > { %p2700_p1 = scmp.eq.s32.totalorder %s2229_s28, 0  ;;  %p2231_p2 = scmp.ge.s32.totalorder %s2624_s27, 1 }
   0x7   : > { %p216_p3 = scmp.lt.s32.totalorder %s2624_s27, 3  ;;  %s2626_s9 = smov [#allocation4]  }
   0x8   : > { %s3493_s29 = scalar_select %p2700_p1, 1, 0 }
   0x9   : > { %p2708_p4 = por %p2700_p1, %p43_p0  ;;  %p2712_p5 = pnand %p2231_p2, %p216_p3 }
   0xa   : > { %s228_s10 = sshll.u32 %s2626_s9, 4  ;;  %s2627_s12 = smov [#allocation6]   ;;  %s2716_s10 = int_to_ptr.vmem [resolvable:$true] %s228_s10 }
   0xb   : > { %s3494_s30 = scalar_select %p2708_p4, 1, 0 }
   0xc   : > { %s3495_s8 = scalar_select %p2712_p5, 1, 0 }
   0xd   : > { %p2394_p6 = pneg %p2712_p5  ;;  %s241_s13 = sshll.u32 %s2627_s12, 4  ;;  %s2726_s13 = int_to_ptr.vmem [resolvable:$true] %s241_s13 }
   0xe   : > { %s2628_s14 = smov [#allocation7]   ;;  %s2468_s18 = scalar_lea.hbm %s3483_s2, 1536 }
   0xf   : > { %p2722_p7 = pnand %p2394_p6, %p2700_p1  ;;  %s2728_s15 = sshll.u32 %s2628_s14, 4  ;;  %s255_s15 = int_to_ptr.vmem [resolvable:$true] %s2728_s15 }
  0x10   : > { %p2469_p8 = scmp.ne.s32.totalorder %s3483_s2, %s2468_s18  ;;  %p2475_p12 = scmp.lt.u32.totalorder %s2468_s18, %s3483_s2 }
  0x11   : > { %p2738_p9 = pneg %p2722_p7 }
  0x13   : > { %p2471_p10 = pnand %p2738_p9, %p2469_p8 }
  0x15   : > { %p2472_p11 = pneg %p2471_p10 }
  0x17   : > { %p2477_p13 = pnand %p2475_p12, %p2472_p11 }
  0x19   : > { %2480 = shalt.err (!%p2477_p13)
}
  0x1a   : > { %s2481_s24 = scalar_lea.vmem %s2716_s10, 1536  ;;  %p2489_p6 = scmp.lt.s32.totalorder %s2716_s10, %s2716_s10 }
  0x1b   : > { %p2482_p0 = scmp.ne.s32.totalorder %s2716_s10, %s2481_s24  ;;  %p2490_p1 = scmp.lt.s32.totalorder %s2481_s24, %s2481_s24 }
  0x1d   : > { %p2484_p2 = pnand %p2482_p0, %p2738_p9  ;;  %p2491_p8 = por %p2490_p1, %p2489_p6 }
  0x1f   : > { %p2485_p3 = pneg %p2484_p2 }
  0x21   : > { %p2492_p10 = pnand %p2491_p8, %p2485_p3 }
  0x23   : > { %2495 = shalt.err (!%p2492_p10)
}
  0x24   : > { %s2629_s9 = smov 256   ;;  %s2630_s12 = smov 16  }
  0x25   : > { %2397 = dma.hbm_to_vmem [thread:$0]  (!%p2722_p7), %s3483_s2, 1536, %s2716_s10, [#allocation5], %s2629_s9, %s2629_s9, %s2630_s12  }
  0x26   : > { %s2496_s19 = scalar_lea.hbm %s3484_s3, 8192 }
  0x27   : > { %p2497_p1 = scmp.ne.s32.totalorder %s3484_s3, %s2496_s19  ;;  %p2503_p13 = scmp.lt.u32.totalorder %s2496_s19, %s3484_s3 }
  0x29   : > { %p2499_p11 = pnand %p2497_p1, %p2738_p9 }
  0x2b   : > { %p2500_p12 = pneg %p2499_p11 }
  0x2d   : > { %p2505_p0 = pnand %p2503_p13, %p2500_p12 }
  0x2f   : > { %2508 = shalt.err (!%p2505_p0)
}
  0x30   : > { %s2509_s10 = scalar_lea.vmem %s2726_s13, 8192  ;;  %p2517_p8 = scmp.lt.s32.totalorder %s2726_s13, %s2726_s13 }
  0x31   : > { %p2510_p2 = scmp.ne.s32.totalorder %s2726_s13, %s2509_s10  ;;  %p2518_p10 = scmp.lt.s32.totalorder %s2509_s10, %s2509_s10 }
  0x33   : > { %p2512_p3 = pnand %p2510_p2, %p2738_p9  ;;  %p2519_p1 = por %p2518_p10, %p2517_p8 }
  0x35   : > { %p2513_p6 = pneg %p2512_p3 }
  0x37   : > { %p2520_p11 = pnand %p2519_p1, %p2513_p6 }
  0x39   : > { %2523 = shalt.err (!%p2520_p11)
}
  0x3a   : > { %2400 = dma.hbm_to_vmem [thread:$0]  (!%p2722_p7), %s3484_s3, 8192, %s2726_s13, [#allocation5], %s2629_s9, %s2629_s9, %s2630_s12  }
  0x3b   : > { %s2524_s19 = scalar_lea.hbm %s3485_s4, 4096 }
  0x3c   : > { %p2525_p12 = scmp.ne.s32.totalorder %s3485_s4, %s2524_s19  ;;  %p2531_p2 = scmp.lt.u32.totalorder %s2524_s19, %s3485_s4 }
  0x3e   : > { %p2527_p13 = pnand %p2525_p12, %p2738_p9 }
  0x40   : > { %p2528_p0 = pneg %p2527_p13 }
  0x42   : > { %p2533_p3 = pnand %p2531_p2, %p2528_p0 }
  0x44   : > { %2536 = shalt.err (!%p2533_p3)
}
  0x45   : > { %s2537_s10 = scalar_lea.vmem %s255_s15, 4096  ;;  %p2545_p1 = scmp.lt.s32.totalorder %s255_s15, %s255_s15 }
  0x46   : > { %p2538_p6 = scmp.ne.s32.totalorder %s255_s15, %s2537_s10  ;;  %p2546_p11 = scmp.lt.s32.totalorder %s2537_s10, %s2537_s10 }
  0x48   : > { %p2540_p8 = pnand %p2538_p6, %p2738_p9  ;;  %p2547_p4 = por %p2546_p11, %p2545_p1 }
  0x4a   : > { %p2541_p10 = pneg %p2540_p8 }
  0x4c   : > { %p2548_p5 = pnand %p2547_p4, %p2541_p10 }
  0x4e   : > { %2551 = shalt.err (!%p2548_p5)
}
  0x4f   : > { %2403 = dma.hbm_to_vmem [thread:$0]  (!%p2722_p7), %s3485_s4, 4096, %s255_s15, [#allocation8], %s2629_s9, %s2629_s9, %s2630_s12  }
  0x50   : > { %s2811_s21 = sadd.s32 1, %s2624_s27   ;;  %s30_s16 = sadd.s32 1, %s2620_s26 }
  0x51   : > { %s27_s11 = ssub.s32 %s2624_s27, %s2811_s21  ;;  %p37_p5 = scmp.ne.s32.totalorder %s2620_s26, %s2616_s25 }
  0x52   : > { %p28_p4 = scmp.eq.s32.totalorder %s27_s11, 0  ;;  %p38_p9 = scmp.eq.s32.totalorder %s2624_s27, 0 }
  0x53   : > { %p2411_p12 = scmp.lt.s32.totalorder %s2624_s27, 2  ;;  %s271_s18 = sand.u32 1, %s2620_s26  }
  0x54   : > { %s2821_s17 = scalar_select %p28_p4, %s2620_s26, %s30_s16  }
  0x55   : > { %p39_p13 = por %p38_p9, %p37_p5  ;;  %s2236_s19 = sshll.u32 %s271_s18, 7 }
  0x56   : > { %s2271_s20 = sshll.u32 %s2624_s27, 11  ;;  %s275_s15 = scalar_lea.vmem [#allocation2], %s2236_s19 }
  0x57   : > { %s2828_s24 = scalar_lea.hbm %s3481_s0, %s2271_s20  ;;  %s282_s9 = sshll.u32 %s275_s15, 4  ;;  %s2830_s9 = int_to_ptr.vmem [resolvable:$true] %s282_s9 }
  0x58   : > { %p2832_p7 = pnand %p2411_p12, %p39_p13  ;;  %s2836_s10 = scalar_lea.sflag [#allocation3], %s271_s18 }
  0x59   : > { %s2552_s13 = scalar_lea.hbm %s2828_s24, 2048  ;;  %s2557_s16 = scalar_lea.hbm %s3481_s0, 4096 }
  0x5a   : > { %p2553_p0 = scmp.ne.s32.totalorder %s2828_s24, %s2552_s13  ;;  %p2554_p2 = pneg %p2832_p7 }
  0x5b   : > { %p2558_p8 = scmp.lt.u32.totalorder %s2828_s24, %s3481_s0  ;;  %p2559_p10 = scmp.lt.u32.totalorder %s2557_s16, %s2552_s13 }
  0x5c   : > { %p2555_p3 = pnand %p2554_p2, %p2553_p0  ;;  %p2561_p11 = scmp.lt.u32.totalorder %s2552_s13, %s2828_s24 }
  0x5d   : > { %p2560_p1 = por %p2559_p10, %p2558_p8 }
  0x5e   : > { %p2556_p6 = pneg %p2555_p3 }
  0x5f   : > { %p2562_p4 = por %p2561_p11, %p2560_p1 }
  0x61   : > { %p2563_p5 = pnand %p2562_p4, %p2556_p6 }
  0x63   : > { %2566 = shalt.err (!%p2563_p5)
}
  0x64   : > { %s2567_s18 = scalar_lea.vmem %s2830_s9, 2048  ;;  %s2631_s22 = smov [#allocation2]  }
  0x65   : > { %p2568_p9 = scmp.ne.s32.totalorder %s2830_s9, %s2567_s18  ;;  %s2572_s23 = sshll.u32 %s2631_s22, 4  ;;  %s2573_s23 = int_to_ptr.vmem [resolvable:$false] %s2572_s23 }
  0x66   : > { %s2574_s15 = scalar_lea.vmem %s2573_s23, 4096  ;;  %p2575_p0 = scmp.lt.s32.totalorder %s2830_s9, %s2573_s23 }
  0x67   : > { %p2570_p12 = pnand %p2568_p9, %p2554_p2  ;;  %p2576_p3 = scmp.lt.s32.totalorder %s2574_s15, %s2567_s18 }
  0x69   : > { %p2571_p13 = pneg %p2570_p12  ;;  %p2577_p8 = por %p2576_p3, %p2575_p0 }
  0x6b   : > { %p2578_p10 = pnand %p2577_p8, %p2571_p13 }
  0x6d   : > { %2581 = shalt.err (!%p2578_p10)
}
  0x6e   : > { %s2632_s13 = smov 128   ;;  %s2633_s14 = smov 8  }
  0x6f   : > { %2407 = dma.hbm_to_vmem [thread:$0]  (!%p2832_p7), %s2828_s24, 2048, %s2830_s9, %s2836_s10, %s2632_s13, %s2632_s13, %s2633_s14  }
  0x70   : > { %p3499_p2 = scmp.ne.s32.totalorder %s3495_s8, 0 }
  0x71   : > { %s305_s11 = sand.u32 (!%p3499_p2), 1, %s2616_s25   ;;  %p3500_p6 = scmp.ne.s32.totalorder (!%p3499_p2), %s3494_s30, 0 }
  0x72   : > { %303 = sbr.rel (%p3499_p2) target bundleno = 1297 (0x511), region = 44  ;;  %s2240_s16 = sshll.u32 (!%p3499_p2), %s305_s11, 7 }
  0x73   : > { %s306_s19 = scalar_lea.sflag (!%p3499_p2), [#allocation3], %s305_s11  ;;  %s2867_s20 = scalar_lea.vmem (!%p3499_p2), [#allocation2], %s2240_s16 }
  0x79   : > { %2599 = dma.done.wait (%p3500_p6), %s306_s19, 2048  }
  0x7a   : > { %2601 = vsyncadd (%p3500_p6), %s306_s19, 4294965248  ;;  %p3501_p1 = scmp.ne.s32.totalorder %s3493_s29, 0 }
  0x7c   : > { %2603 = dma.done.wait (%p3501_p1), [#allocation5], 9728  }
  0x7d   : > { %2605 = vsyncadd (%p3501_p1), [#allocation5], 4294957568 }
  0x7e   : > { %2607 = dma.done.wait (%p3501_p1), [#allocation8], 4096  }
  0x7f   : > { %2609 = vsyncadd (%p3501_p1), [#allocation8], 4294963200  ;;  %s2244_s8 = sshll.u32 %s2229_s28, 1  ;;  %v399_v0 = vlaneseq  ;;  %v2634_v1 = vmov 0.0   ;;  %v522_v5 = vld [vmem:[#allocation4 + $0x8] sm:$0xff]  ;;  %v524_v6 = vld [vmem:[#allocation4 + $0x18] sm:$0xff] }
  0x80   : > { %657 = vmatprep.mubr.f32.mxu0 %v2634_v1  ;;  %p364_p7 = scmp.lt.s32.totalorder %s2244_s8, 3  ;;  %v521_v7 = vld [vmem:[#allocation4] sm:$0xff]  ;;  %v2272_v8 = vpack.c.bf16 %v524_v6, %v522_v5  ;;  %v523_v9 = vld [vmem:[#allocation4 + $0x10] sm:$0xff]  ;;  %v526_v10 = vld [vmem:[#allocation4 + $0x28] sm:$0xff]  ;;  %vm544_vm0 = vcmask 392192   ;;  %vm1506_vm1 = vcmask 1041409  }
  0x81   : > { %v2884_v2 = vshrl.u32 %v399_v0, 7  ;;  %v1441_v3 = vand.u32 127, %v399_v0  ;;  %v528_v11 = vld [vmem:[#allocation4 + $0x38] sm:$0xff]  ;;  %v2274_v12 = vpack.c.bf16 %v523_v9, %v521_v7  ;;  %v525_v14 = vld [vmem:[#allocation4 + $0x20] sm:$0xff]  ;;  %v527_v15 = vld [vmem:[#allocation4 + $0x30] sm:$0xff]  ;;  %vm1508_vm2 = vcmask 1042434  }
  0x82   : > { %s3507_s8 = smov (!%p364_p7, %s2244_s8), 3  ;;  %v2276_v13 = vpack.c.bf16 %v528_v11, %v526_v10  ;;  %v530_v16 = vld [vmem:[#allocation4 + $0x48] sm:$0xff]  ;;  %2273 = vmatprep.subr.bf16.mxu0 %v2272_v8  ;;  %v532_v17 = vld [vmem:[#allocation4 + $0x58] sm:$0xff]  ;;  %v2278_v18 = vpack.c.bf16 %v527_v15, %v525_v14  ;;  %v529_v20 = vld [vmem:[#allocation4 + $0x40] sm:$0xff]  ;;  %vm1510_vm3 = vcmask 1043459   ;;  %vm1512_vm4 = vcmask 1044484  }
  0x83   : > { %v2887_v4 = vsub.s32 %v1441_v3, %v2884_v2  ;;  %s2889_s27 = sshll.u32 %s3507_s8, 3  ;;  %2275 = vmatpush1.bf16.msra.mxu0 %v2274_v12  ;;  %v2280_v19 = vpack.c.bf16 %v532_v17, %v530_v16  ;;  %v531_v21 = vld [vmem:[#allocation4 + $0x50] sm:$0xff]  ;;  %v2898_v22 = vsub.s32 0, %v2884_v2  ;;  %v2901_v23 = vsub.s32 2, %v2884_v2  ;;  %v381_v28 = vld [vmem:[%s2867_s20] sm:$0xff]  ;;  %v819_v31 = vld [vmem:[#allocation6 + $0x8] sm:$0xff] }
  0x84   : > { %2277 = vmatprep.subr.bf16.mxu0 %v2276_v13  ;;  %s2895_s30 = scalar_lea.vmem %s3482_s1, %s2889_s27  ;;  %v2282_v24 = vpack.c.bf16 %v531_v21, %v529_v20  ;;  %v2904_v25 = vsub.s32 1, %v2884_v2  ;;  %v2908_v27 = vsub.s32 3, %v2884_v2  ;;  %v821_v32 = vld [vmem:[#allocation6 + $0x18] sm:$0xff]  ;;  %v818_v33 = vld [vmem:[#allocation6] sm:$0xff]  ;;  %v2922_v35 = vsub.s32 4, %v2884_v2  ;;  %v820_v36 = vld [vmem:[#allocation6 + $0x10] sm:$0xff]  ;;  %s3441_s9 = scalar_lea.vmem %s3487_s6, %s2889_s27 }
  0x85   : > { %v397_v26 = vld [vmem:[%s2895_s30] sm:$0xff]  ;;  %v823_v37 = vld [vmem:[#allocation6 + $0x28] sm:$0xff]  ;;  %v825_v38 = vld [vmem:[#allocation6 + $0x38] sm:$0xff]  ;;  %v2929_v40 = vsub.s32 5, %v2884_v2  ;;  %v2284_v41 = vpack.c.bf16 %v821_v32, %v819_v31  ;;  %v2286_v42 = vpack.c.bf16 %v820_v36, %v818_v33  ;;  %v2939_v48 = vsub.s32 6, %v2884_v2  ;;  %s2637_s29 = smov 126   ;;  %s379_s18 = scalar_lea.vmem %s3488_s7, %s2889_s27 }
  0x86   : > { %v2912_v29 = vrot.slane %v397_v26, %v2898_v22  ;;  %v2915_v30 = vrot.slane %v397_v26, %v2901_v23  ;;  %v2919_v34 = vrot.slane %v397_v26, %v2904_v25  ;;  %v2926_v39 = vrot.slane %v397_v26, %v2908_v27  ;;  %v822_v44 = vld [vmem:[#allocation6 + $0x20] sm:$0xff]  ;;  %v824_v45 = vld [vmem:[#allocation6 + $0x30] sm:$0xff]  ;;  %v382_v46 = vld [vmem:[%s2867_s20 + $0x8] sm:$0xff] }
  0x87   : > { %2279 = vmatpush1.bf16.msra.mxu0 %v2278_v18  ;;  %v2288_v43 = vpack.c.bf16 %v825_v38, %v823_v37  ;;  %v2936_v47 = vrot.slane %v397_v26, %v2922_v35  ;;  %v827_v49 = vld [vmem:[#allocation6 + $0x48] sm:$0xff]  ;;  %v829_v50 = vld [vmem:[#allocation6 + $0x58] sm:$0xff]  ;;  %v2943_v51 = vrot.slane %v397_v26, %v2929_v40  ;;  %v2946_v52 = vsub.s32 7, %v2884_v2  ;;  %2285 = vmatprep.subr.bf16.mxu1 %v2284_v41  ;;  %v826_v55 = vld [vmem:[#allocation6 + $0x40] sm:$0xff] }
  0x88   : > { %2281 = vmatprep.subr.bf16.mxu0 %v2280_v19  ;;  %404 = vbcast.lane.b32.xlu0 %v2912_v29, 256  ;;  %v2290_v53 = vpack.c.bf16 %v824_v45, %v822_v44  ;;  %v2292_v54 = vpack.c.bf16 %v829_v50, %v827_v49  ;;  %v828_v56 = vld [vmem:[#allocation6 + $0x50] sm:$0xff]  ;;  %v2953_v58 = vrot.slane %v397_v26, %v2939_v48  ;;  %v831_v59 = vld [vmem:[#allocation6 + $0x68] sm:$0xff]  ;;  %v833_v60 = vld [vmem:[#allocation6 + $0x78] sm:$0xff]  ;;  %vm1514_vm5 = vcmask 1045509  }
  0x89   : > { %418 = vbcast.lane.b32.xlu1 %v2915_v30, 256  ;;  %2287 = vmatpush1.bf16.msra.mxu1 %v2286_v42  ;;  %v383_v57 = vld [vmem:[%s2867_s20 + $0x10] sm:$0xff]  ;;  %v2957_v61 = vrot.slane %v397_v26, %v2946_v52  ;;  %v398_v62 = vld [vmem:[%s2895_s30 + $0x8] sm:$0xff]  ;;  %v2294_v63 = vpack.c.bf16 %v828_v56, %v826_v55  ;;  %v2296_v0 = vpack.c.bf16 %v833_v60, %v831_v59  ;;  %v830_v2 = vld [vmem:[#allocation6 + $0x60] sm:$0xff]  ;;  %vm1516_vm6 = vcmask 1046534  }
  0x8a   : > { %2289 = vmatprep.subr.bf16.mxu1 %v2288_v43  ;;  %v832_v3 = vld [vmem:[#allocation6 + $0x70] sm:$0xff]  ;;  %v384_v5 = vld [vmem:[%s2867_s20 + $0x18] sm:$0xff]  ;;  %v2965_v6 = vrot.slane %v398_v62, %v2898_v22  ;;  %v835_v7 = vld [vmem:[#allocation6 + $0x88] sm:$0xff]  ;;  %v2969_v9 = vrot.slane %v398_v62, %v2904_v25  ;;  %v2976_v15 = vrot.slane %v398_v62, %v2901_v23  ;;  %v2980_v18 = vrot.slane %v398_v62, %v2908_v27 }
  0x8b   : > { %2283 = vmatpush1.bf16.msra.mxu0 %v2282_v24  ;;  %v837_v8 = vld [vmem:[#allocation6 + $0x98] sm:$0xff]  ;;  %v2298_v10 = vpack.c.bf16 %v832_v3, %v830_v2  ;;  %v834_v12 = vld [vmem:[#allocation6 + $0x80] sm:$0xff]  ;;  %v836_v13 = vld [vmem:[#allocation6 + $0x90] sm:$0xff]  ;;  %v2991_v33 = vrot.slane %v398_v62, %v2929_v40  ;;  %v2998_v43 = vrot.slane %v398_v62, %v2939_v48  ;;  %vm1518_vm7 = vcmask 1047559  }
  0x8c   : > { %411 = vbcast.lane.b32.xlu0 %v2919_v34, 256  ;;  %v2300_v11 = vpack.c.bf16 %v837_v8, %v835_v7  ;;  %v385_v14 = vld [vmem:[%s2867_s20 + $0x20] sm:$0xff]  ;;  %v839_v16 = vld [vmem:[#allocation6 + $0xa8] sm:$0xff]  ;;  %v841_v17 = vld [vmem:[#allocation6 + $0xb8] sm:$0xff]  ;;  %v2302_v19 = vpack.c.bf16 %v836_v13, %v834_v12  ;;  %vm1369_vm8 = vcmask 64512   ;;  %vm2084_vm11 = vcmask 7168  }
  0x8d   : > { %425 = vbcast.lane.b32.xlu1 %v2926_v39, 256  ;;  %2291 = vmatpush1.bf16.msra.mxu1 %v2290_v53  ;;  %v2304_v20 = vpack.c.bf16 %v841_v17, %v839_v16  ;;  %v838_v21 = vld [vmem:[#allocation6 + $0xa0] sm:$0xff]  ;;  %v840_v24 = vld [vmem:[#allocation6 + $0xb0] sm:$0xff]  ;;  %v386_v26 = vld [vmem:[%s2867_s20 + $0x28] sm:$0xff] }
  0x8e   : > { %2253 = vmatmul.mubr.msk.f32.vlgmr.msra.gmra.mrb[0].mxu0 %vm544_vm0, %v381_v28  ;;  %2293 = vmatprep.subr.bf16.mxu1 %v2292_v54  ;;  %v2987_v28 = vrot.slane %v398_v62, %v2922_v35  ;;  %v843_v31 = vld [vmem:[#allocation6 + $0xc8] sm:$0xff]  ;;  %v845_v32 = vld [vmem:[#allocation6 + $0xd8] sm:$0xff]  ;;  %v2306_v36 = vpack.c.bf16 %v840_v24, %v838_v21  ;;  %v842_v38 = vld [vmem:[#allocation6 + $0xc0] sm:$0xff] }
  0x8f   : > { %663 = vmatprep.mubr.f32.mxu0 %v2634_v1  ;;  %v2308_v37 = vpack.c.bf16 %v845_v32, %v843_v31  ;;  %v844_v41 = vld [vmem:[#allocation6 + $0xd0] sm:$0xff]  ;;  %v847_v44 = vld [vmem:[#allocation6 + $0xe8] sm:$0xff]  ;;  %v849_v45 = vld [vmem:[#allocation6 + $0xf8] sm:$0xff] }
  0x90   : > { %432 = vbcast.lane.b32.xlu0 %v2936_v47, 256  ;;  %v387_v42 = vld [vmem:[%s2867_s20 + $0x30] sm:$0xff]  ;;  %v2310_v49 = vpack.c.bf16 %v844_v41, %v842_v38  ;;  %v2312_v50 = vpack.c.bf16 %v849_v45, %v847_v44  ;;  %v846_v53 = vld [vmem:[#allocation6 + $0xe0] sm:$0xff]  ;;  %v388_v55 = vld [vmem:[%s2867_s20 + $0x38] sm:$0xff] }
  0x91   : > { %439 = vbcast.lane.b32.xlu1 %v2943_v51, 256  ;;  %2295 = vmatpush1.bf16.msra.mxu1 %v2294_v63  ;;  %v848_v54 = vld [vmem:[#allocation6 + $0xf0] sm:$0xff]  ;;  %v851_v56 = vld [vmem:[#allocation6 + $0x108] sm:$0xff]  ;;  %v857_v3 = vld [vmem:[#allocation6 + $0x138] sm:$0xff] }
  0x92   : > { %2254 = vmatmul.mubr.msk.f32.gmra.mrb[2].mxu0 %vm544_vm0, %v382_v46  ;;  %2297 = vmatprep.subr.bf16.mxu1 %v2296_v0  ;;  %v3002_v46 = vrot.slane %v398_v62, %v2946_v52  ;;  %v2314_v59 = vpack.c.bf16 %v848_v54, %v846_v53  ;;  %v850_v62 = vld [vmem:[#allocation6 + $0x100] sm:$0xff]  ;;  %v852_v63 = vld [vmem:[#allocation6 + $0x110] sm:$0xff]  ;;  %v855_v2 = vld [vmem:[#allocation6 + $0x128] sm:$0xff] }
  0x93   : > { %669 = vmatprep.mubr.f32.mxu0 %v2634_v1  ;;  %v389_v0 = vld [vmem:[%s2867_s20 + $0x40] sm:$0xff]  ;;  %v2320_v7 = vpack.c.bf16 %v857_v3, %v855_v2  ;;  %v859_v12 = vld [vmem:[#allocation6 + $0x148] sm:$0xff]  ;;  %v861_v13 = vld [vmem:[#allocation6 + $0x158] sm:$0xff] }
  0x94   : > { %446 = vbcast.lane.b32.xlu0 %v2953_v58, 256  ;;  %v854_v8 = vld [vmem:[#allocation6 + $0x120] sm:$0xff]  ;;  %v860_v17 = vld [vmem:[#allocation6 + $0x150] sm:$0xff]  ;;  %v865_v21 = vld [vmem:[#allocation6 + $0x178] sm:$0xff] }
  0x95   : > { %453 = vbcast.lane.b32.xlu1 %v2957_v61, 256  ;;  %2299 = vmatpush1.bf16.msra.mxu1 %v2298_v10  ;;  %v856_v10 = vld [vmem:[#allocation6 + $0x130] sm:$0xff]  ;;  %v858_v16 = vld [vmem:[#allocation6 + $0x140] sm:$0xff]  ;;  %v392_v32 = vld [vmem:[%s2867_s20 + $0x58] sm:$0xff] }
  0x96   : > { %2255 = vmatmul.mubr.msk.f32.gmra.mrb[4].mxu0 %vm544_vm0, %v383_v57  ;;  %2301 = vmatprep.subr.bf16.mxu1 %v2300_v11  ;;  %v853_v57 = vld [vmem:[#allocation6 + $0x118] sm:$0xff]  ;;  %v390_v11 = vld [vmem:[%s2867_s20 + $0x48] sm:$0xff]  ;;  %v2326_v24 = vpack.c.bf16 %v860_v17, %v858_v16  ;;  %v864_v31 = vld [vmem:[#allocation6 + $0x170] sm:$0xff] }
  0x97   : > { %675 = vmatprep.mubr.f32.mxu0 %v2634_v1  ;;  %v2316_v60 = vpack.c.bf16 %v853_v57, %v851_v56  ;;  %v866_v41 = vld [vmem:[#allocation6 + $0x180] sm:$0xff]  ;;  %v871_v45 = vld [vmem:[#allocation6 + $0x1a8] sm:$0xff]  ;;  %v872_v54 = vld [vmem:[#allocation6 + $0x1b0] sm:$0xff] }
  0x98   : > { %460 = vbcast.lane.b32.xlu0 %v2965_v6, 256  ;;  %v393_v44 = vld [vmem:[%s2867_s20 + $0x60] sm:$0xff]  ;;  %v396_v57 = vld [vmem:[%s2867_s20 + $0x78] sm:$0xff]  ;;  %v879_v2 = vld [vmem:[#allocation6 + $0x1e8] sm:$0xff] }
  0x99   : > { %467 = vbcast.lane.b32.xlu1 %v2969_v9, 256  ;;  %2303 = vmatpush1.bf16.msra.mxu1 %v2302_v19  ;;  %v391_v19 = vld [vmem:[%s2867_s20 + $0x50] sm:$0xff]  ;;  %v870_v53 = vld [vmem:[#allocation6 + $0x1a0] sm:$0xff]  ;;  %v1906_v16 = vld [vmem:[#allocation7 + $0x28] sm:$0xff] }
  0x9a   : > { %2256 = vmatmul.mubr.msk.f32.gmra.mrb[6].mxu0 %vm544_vm0, %v384_v5  ;;  %2305 = vmatprep.subr.bf16.mxu1 %v2304_v20  ;;  %v2318_v5 = vpack.c.bf16 %v852_v63, %v850_v62  ;;  %v863_v20 = vld [vmem:[#allocation6 + $0x168] sm:$0xff]  ;;  %v2338_v56 = vpack.c.bf16 %v872_v54, %v870_v53  ;;  %v874_v62 = vld [vmem:[#allocation6 + $0x1c0] sm:$0xff]  ;;  %v876_v63 = vld [vmem:[#allocation6 + $0x1d0] sm:$0xff] }
  0x9b   : > { %681 = vmatprep.mubr.f32.mxu0 %v2634_v1  ;;  %v1908_v17 = vld [vmem:[#allocation7 + $0x38] sm:$0xff]  ;;  %v1917_v53 = vld [vmem:[#allocation7 + $0x80] sm:$0xff]  ;;  %v1919_v54 = vld [vmem:[#allocation7 + $0x90] sm:$0xff] }
  0x9c   : > { %474 = vbcast.lane.b32.xlu0 %v2976_v15, 256 }
  0x9d   : > { %481 = vbcast.lane.b32.xlu1 %v2980_v18, 256  ;;  %2307 = vmatpush1.bf16.msra.mxu1 %v2306_v36  ;;  %v867_v36 = vld [vmem:[#allocation6 + $0x188] sm:$0xff] }
  0x9e   : > { %2257 = vmatmul.mubr.msk.f32.gmra.mrb[8].mxu0 %vm544_vm0, %v385_v14  ;;  %2309 = vmatprep.subr.bf16.mxu1 %v2308_v37  ;;  %v2322_v14 = vpack.c.bf16 %v856_v10, %v854_v8  ;;  %v869_v37 = vld [vmem:[#allocation6 + $0x198] sm:$0xff]  ;;  %v1902_v10 = vld [vmem:[#allocation7 + $0x8] sm:$0xff] }
  0x9f   : > { %687 = vmatprep.mubr.f32.mxu0 %v2634_v1 }
  0xa0   : > { %488 = vbcast.lane.b32.xlu0 %v2987_v28, 256 }
  0xa1   : > { %495 = vbcast.lane.b32.xlu1 %v2991_v33, 256  ;;  %2311 = vmatpush1.bf16.msra.mxu1 %v2310_v49  ;;  %v873_v49 = vld [vmem:[#allocation6 + $0x1b8] sm:$0xff] }
  0xa2   : > { %2258 = vmatmul.mubr.msk.f32.gmra.mrb[10].mxu0 %vm544_vm0, %v386_v26  ;;  %2313 = vmatprep.subr.bf16.mxu1 %v2312_v50  ;;  %v862_v26 = vld [vmem:[#allocation6 + $0x160] sm:$0xff] }
  0xa3   : > { %693 = vmatprep.mubr.f32.mxu0 %v2634_v1  ;;  %v2330_v38 = vpack.c.bf16 %v864_v31, %v862_v26  ;;  %v1912_v26 = vld [vmem:[#allocation7 + $0x58] sm:$0xff] }
  0xa4   : > { %502 = vbcast.lane.b32.xlu0 %v2998_v43, 256 }
  0xa5   : > { %509 = vbcast.lane.b32.xlu1 %v3002_v46, 256  ;;  %2315 = vmatpush1.bf16.msra.mxu1 %v2314_v59  ;;  %v877_v59 = vld [vmem:[#allocation6 + $0x1d8] sm:$0xff] }
  0xa6   : > { %2259 = vmatmul.mubr.msk.f32.gmra.mrb[12].mxu0 %vm544_vm0, %v387_v42  ;;  %2317 = vmatprep.subr.bf16.mxu1 %v2316_v60  ;;  %v868_v42 = vld [vmem:[#allocation6 + $0x190] sm:$0xff] }
  0xa7   : > { %699 = vmatprep.mubr.f32.mxu0 %v2634_v1  ;;  %v2334_v50 = vpack.c.bf16 %v868_v42, %v866_v41  ;;  %v1913_v42 = vld [vmem:[#allocation7 + $0x60] sm:$0xff] }
  0xa8   : > { %1230 = vbcast.lane.b32.xlu0 %v2912_v29, 256  ;;  %v2324_v29 = vpack.c.bf16 %v861_v13, %v859_v12  ;;  %v1901_v13 = vld [vmem:[#allocation7] sm:$0xff] }
  0xa9   : > { %2319 = vmatpush1.bf16.msra.mxu1 %v2318_v5  ;;  %v878_v5 = vld [vmem:[#allocation6 + $0x1e0] sm:$0xff] }
  0xaa   : > { %2260 = vmatmul.mubr.msk.f32.gmra.mrb[14].mxu0 %vm544_vm0, %v388_v55  ;;  %2321 = vmatprep.subr.bf16.mxu1 %v2320_v7  ;;  %v394_v55 = vld [vmem:[%s2867_s20 + $0x68] sm:$0xff]  ;;  %v880_v7 = vld [vmem:[#allocation6 + $0x1f0] sm:$0xff] }
  0xab   : > { %705 = vmatprep.mubr.f32.mxu0 %v2634_v1  ;;  %v2346_v8 = vpack.c.bf16 %v880_v7, %v878_v5  ;;  %v1930_v5 = vld [vmem:[#allocation7 + $0xe8] sm:$0xff]  ;;  %v1932_v7 = vld [vmem:[#allocation7 + $0xf8] sm:$0xff] }
  0xac   : > { %1286 = vbcast.lane.b32.xlu0 %v2965_v6, 256  ;;  %v2328_v6 = vpack.c.bf16 %v865_v21, %v863_v20  ;;  %v1905_v20 = vld [vmem:[#allocation7 + $0x20] sm:$0xff]  ;;  %v1907_v21 = vld [vmem:[#allocation7 + $0x30] sm:$0xff] }
  0xad   : > { %2323 = vmatpush1.bf16.msra.mxu1 %v2322_v14  ;;  %v1903_v14 = vld [vmem:[#allocation7 + $0x10] sm:$0xff] }
  0xae   : > { %2261 = vmatmul.mubr.msk.f32.gmra.mrb[16].mxu0 %vm544_vm0, %v389_v0  ;;  %2325 = vmatprep.subr.bf16.mxu1 %v2324_v29  ;;  %v2342_v0 = vpack.c.bf16 %v876_v63, %v874_v62  ;;  %v2350_v29 = vpack.c.bf16 %v1903_v14, %v1901_v13  ;;  %v1926_v62 = vld [vmem:[#allocation7 + $0xc8] sm:$0xff]  ;;  %v1928_v63 = vld [vmem:[#allocation7 + $0xd8] sm:$0xff]  ;;  %v3045_v13 = vld [vmem:[%s3486_s5 + $0x6] ss:$0 sm:$0xff]  ;;  %v2635_v14 = vmov 1  }
  0xaf   : > { %711 = vmatprep.mubr.f32.mxu0 %v2634_v1  ;;  %2458 = vset.pattern.permute.xlu1 %v2635_v14 }
  0xb0   : > { %1251 = vbcast.lane.b32.xlu0 %v2926_v39, 256  ;;  %v2332_v39 = vpack.c.bf16 %v869_v37, %v867_v36  ;;  %v1911_v36 = vld [vmem:[#allocation7 + $0x50] sm:$0xff]  ;;  %1204 = vperm.xlu1 %2458, %v3045_v13  }
  0xb1   : > { %2327 = vmatpush1.bf16.msra.mxu1 %v2326_v24  ;;  %v2354_v24 = vpack.c.bf16 %v1907_v21, %v1905_v20 }
  0xb2   : > { %2262 = vmatmul.mubr.msk.f32.gmra.mrb[18].mxu0 %vm544_vm0, %v390_v11  ;;  %2329 = vmatprep.subr.bf16.mxu1 %v2328_v6  ;;  %v1904_v11 = vld [vmem:[#allocation7 + $0x18] sm:$0xff]  ;;  %v1910_v6 = vld [vmem:[#allocation7 + $0x48] sm:$0xff] }
  0xb3   : > { %717 = vmatprep.mubr.f32.mxu0 %v2634_v1  ;;  %v2348_v12 = vpack.c.bf16 %v1904_v11, %v1902_v10  ;;  %v2356_v31 = vpack.c.bf16 %v1912_v26, %v1910_v6  ;;  %v1929_v10 = vld [vmem:[#allocation7 + $0xe0] sm:$0xff]  ;;  %v1931_v11 = vld [vmem:[#allocation7 + $0xf0] sm:$0xff] }
  0xb4   : > { %1258 = vbcast.lane.b32.xlu0 %v2936_v47, 256  ;;  %v2336_v47 = vpack.c.bf16 %v873_v49, %v871_v45  ;;  %v1918_v49 = vld [vmem:[#allocation7 + $0x88] sm:$0xff]  ;;  %1237 = vbcast.lane.b32.xlu1 %v2919_v34, 256 }
  0xb5   : > { %2331 = vmatpush1.bf16.msra.mxu1 %v2330_v38  ;;  %2349 = vmatprep.subr.bf16.mxu0 %v2348_v12  ;;  %v1914_v38 = vld [vmem:[#allocation7 + $0x68] sm:$0xff]  ;;  %v2378_v12 = vpack.c.bf16 %v1931_v11, %v1929_v10 }
  0xb6   : > { %2263 = vmatmul.mubr.msk.f32.gmra.mrb[20].mxu0 %vm544_vm0, %v391_v19  ;;  %2333 = vmatprep.subr.bf16.mxu1 %v2332_v39  ;;  %v2352_v19 = vpack.c.bf16 %v1908_v17, %v1906_v16  ;;  %v1916_v39 = vld [vmem:[#allocation7 + $0x78] sm:$0xff] }
  0xb7   : > { %723 = vmatprep.mubr.f32.mxu0 %v2634_v1  ;;  %2351 = vmatpush1.bf16.msra.mxu0 %v2350_v29  ;;  %v2360_v41 = vpack.c.bf16 %v1916_v39, %v1914_v38  ;;  %v511_v29 = vld [vmem:[%s3486_s5] ss:$8 sm:$0x3] }
  0xb8   : > { %1265 = vbcast.lane.b32.xlu0 %v2943_v51, 256  ;;  %v395_v51 = vld [vmem:[%s2867_s20 + $0x70] sm:$0xff]  ;;  %2353 = vmatprep.subr.bf16.mxu0 %v2352_v19  ;;  %v3059_v16 = vrot.slane %v511_v29, %v2898_v22  ;;  %v3062_v34 = vrot.slane %v511_v29, %v2904_v25 }
  0xb9   : > { %2335 = vmatpush1.bf16.msra.mxu1 %v2334_v50  ;;  %v1920_v50 = vld [vmem:[#allocation7 + $0x98] sm:$0xff]  ;;  %1244 = vbcast.lane.b32.xlu1 %v2915_v30, 256 }
  0xba   : > { %2264 = vmatmul.mubr.msk.f32.gmra.mrb[22].mxu0 %vm544_vm0, %v392_v32  ;;  %2337 = vmatprep.subr.bf16.mxu1 %v2336_v47  ;;  %v1909_v32 = vld [vmem:[#allocation7 + $0x40] sm:$0xff]  ;;  %v2364_v47 = vpack.c.bf16 %v1920_v50, %v1918_v49 }
  0xbb   : > { %729 = vmatprep.mubr.f32.mxu0 %v2634_v1  ;;  %2355 = vmatpush1.bf16.msra.mxu0 %v2354_v24  ;;  %v2358_v37 = vpack.c.bf16 %v1911_v36, %v1909_v32 }
  0xbc   : > { %1272 = vbcast.lane.b32.xlu0 %v2953_v58, 256  ;;  %v875_v58 = vld [vmem:[#allocation6 + $0x1c8] sm:$0xff]  ;;  %2357 = vmatprep.subr.bf16.mxu0 %v2356_v31 }
  0xbd   : > { %2339 = vmatpush1.bf16.msra.mxu1 %v2338_v56  ;;  %v2340_v60 = vpack.c.bf16 %v877_v59, %v875_v58  ;;  %v1922_v56 = vld [vmem:[#allocation7 + $0xa8] sm:$0xff]  ;;  %v1921_v58 = vld [vmem:[#allocation7 + $0xa0] sm:$0xff]  ;;  %v1923_v59 = vld [vmem:[#allocation7 + $0xb0] sm:$0xff]  ;;  %1293 = vbcast.lane.b32.xlu1 %v2969_v9, 256 }
  0xbe   : > { %2265 = vmatmul.mubr.msk.f32.gmra.mrb[24].mxu0 %vm544_vm0, %v393_v44  ;;  %v1915_v44 = vld [vmem:[#allocation7 + $0x70] sm:$0xff] }
  0xbf   : > { %735 = vmatprep.mubr.f32.mxu0 %v2634_v1  ;;  %2341 = vmatprep.subr.bf16.mxu1 %v2340_v60  ;;  %v2362_v45 = vpack.c.bf16 %v1915_v44, %v1913_v42  ;;  %v2370_v60 = vpack.c.bf16 %v1923_v59, %v1921_v58 }
  0xc0   : > { %1279 = vbcast.lane.b32.xlu0 %v2957_v61, 256  ;;  %v881_v61 = vld [vmem:[#allocation6 + $0x1f8] sm:$0xff]  ;;  %2359 = vmatpush1.bf16.msra.mxu0 %v2358_v37 }
  0xc1   : > { %2343 = vmatpush1.bf16.msra.mxu1 %v2342_v0  ;;  %v2344_v3 = vpack.c.bf16 %v881_v61, %v879_v2  ;;  %2361 = vmatprep.subr.bf16.mxu0 %v2360_v41  ;;  %v2372_v0 = vpack.c.bf16 %v1928_v63, %v1926_v62  ;;  %v1925_v2 = vld [vmem:[#allocation7 + $0xc0] sm:$0xff]  ;;  %v1927_v61 = vld [vmem:[#allocation7 + $0xd0] sm:$0xff] }
  0xc2   : > { %2266 = vmatmul.mubr.msk.f32.gmra.mrb[26].mxu0 %vm544_vm0, %v394_v55  ;;  %v2366_v55 = vpack.c.bf16 %v1919_v54, %v1917_v53  ;;  %1300 = vbcast.lane.b32.xlu1 %v2976_v15, 256 }
  0xc3   : > { %741 = vmatprep.mubr.f32.mxu0 %v2634_v1  ;;  %2345 = vmatprep.subr.bf16.mxu1 %v2344_v3  ;;  %v2374_v3 = vpack.c.bf16 %v1927_v61, %v1925_v2 }
  0xc4   : > { %2363 = vmatpush1.bf16.msra.mxu0 %v2362_v45 }
  0xc5   : > { %2347 = vmatpush1.bf16.msra.mxu1 %v2346_v8  ;;  %2365 = vmatprep.subr.bf16.mxu0 %v2364_v47  ;;  %v2376_v8 = vpack.c.bf16 %v1932_v7, %v1930_v5 }
  0xc6   : > { %2267 = vmatmul.mubr.msk.f32.gmra.mrb[28].mxu0 %vm544_vm0, %v395_v51  ;;  %v1924_v51 = vld [vmem:[#allocation7 + $0xb8] sm:$0xff]  ;;  %1307 = vbcast.lane.b32.xlu1 %v2980_v18, 256 }
  0xc7   : > { %747 = vmatprep.mubr.f32.mxu0 %v2634_v1 }
  0xc8   : > { %2367 = vmatpush1.bf16.msra.mxu0 %v2366_v55 }
  0xca   : > { %2268 = vmatmul.mubr.msk.f32.gmra.mrb[30].mxu0 %vm544_vm0, %v396_v57  ;;  %v2368_v57 = vpack.c.bf16 %v1924_v51, %v1922_v56  ;;  %1314 = vbcast.lane.b32.xlu1 %v2987_v28, 256 }
  0xcb   : > { %2040 = vmatprep.mubr.f32.mxu0 %v2634_v1 }
  0xcc   : > { %2369 = vmatprep.subr.bf16.mxu0 %v2368_v57 }
  0xcd   : > { %2371 = vmatpush1.bf16.msra.mxu0 %v2370_v60 }
  0xce   : > { %2373 = vmatprep.subr.bf16.mxu0 %v2372_v0  ;;  %1321 = vbcast.lane.b32.xlu1 %v2991_v33, 256 }
  0xd1   : > { %2375 = vmatpush1.bf16.msra.mxu0 %v2374_v3 }
  0xd2   : > { %2377 = vmatprep.subr.bf16.mxu0 %v2376_v8 }
  0xd5   : > { %2379 = vmatpush1.bf16.msra.mxu0 %v2378_v12 }
  0xfa   : > { %v405_v9 = vpop.permute.xlu0 %404 }
  0xfb   : > { %v419_v39 = vpop.permute.xlu1 %418 }
  0xfe   : > { %v412_v26 = vpop.permute.xlu0 %411 }
  0xff   : > { %v426_v0 = vpop.permute.xlu1 %425 }
 0x161   : > { %v659_v30 = vpop.f32.mrb[0].mxu0 }
 0x162   : > { %v660_v15 = vadd.f32 %v659_v30, %v3059_v16  ;;  %v661_v17 = vpop.f32.mrb[1].mxu0 }
 0x163   : > { %v662_v18 = vadd.f32 %v661_v17, %v3062_v34 }
 0x164   : > { %v754_v28 = vmax.f32 %v660_v15, 0.0 }
 0x165   : > { %v755_v19 = vmax.f32 %v662_v18, 0.0  ;;  %v665_v33 = vpop.f32.mrb[2].mxu0 }
 0x166   : > { %v786_v20 = vmul.f32 %v754_v28, %v405_v9  ;;  %v666_v21 = vadd.f32 %v665_v33, %v3059_v16  ;;  %v667_v24 = vpop.f32.mrb[3].mxu0  ;;  %v433_v28 = vpop.permute.xlu0 %432 }
 0x167   : > { %v668_v6 = vadd.f32 %v667_v24, %v3062_v34  ;;  %v787_v31 = vmul.f32 %v755_v19, %v405_v9 }
 0x168   : > { %v1805_v32 = vrot.slane %v786_v20, 4  ;;  %v756_v36 = vmax.f32 %v666_v21, 0.0 }
 0x169   : > { %v757_v37 = vmax.f32 %v668_v6, 0.0  ;;  %v671_v38 = vpop.f32.mrb[4].mxu0  ;;  %957 = vmatprep.mubr.f32.mxu1 %v787_v31 }
 0x16a   : > { %v1806_v41 = vmax.f32 %v786_v20, %v1805_v32  ;;  %v788_v42 = vmul.f32 %v756_v36, %v412_v26  ;;  %v672_v44 = vadd.f32 %v671_v38, %v3059_v16  ;;  %v673_v45 = vpop.f32.mrb[5].mxu0  ;;  %958 = vmatmul.mubr.f32.vlgmr.msra.gmra.mrb[0].mxu1 %v786_v20 }
 0x16b   : > { %v789_v49 = vmul.f32 %v757_v37, %v412_v26  ;;  %v674_v50 = vadd.f32 %v673_v45, %v3062_v34 }
 0x16c   : > { %v1807_v47 = vrot.slane %v1806_v41, 2  ;;  %v1811_v53 = vrot.slane %v788_v42, 4  ;;  %v758_v54 = vmax.f32 %v672_v44, 0.0 }
 0x16d   : > { %v759_v55 = vmax.f32 %v674_v50, 0.0  ;;  %v677_v56 = vpop.f32.mrb[6].mxu0  ;;  %963 = vmatprep.mubr.f32.mxu1 %v789_v49 }
 0x16e   : > { %v1808_v51 = vmax.f32 %v1806_v41, %v1807_v47  ;;  %v1812_v57 = vmax.f32 %v788_v42, %v1811_v53  ;;  %v790_v58 = vmul.f32 %v758_v54, %v419_v39  ;;  %v678_v59 = vadd.f32 %v677_v56, %v3059_v16  ;;  %v679_v60 = vpop.f32.mrb[7].mxu0  ;;  %964 = vmatmul.mubr.f32.gmra.mrb[2].mxu1 %v788_v42 }
 0x16f   : > { %v791_v62 = vmul.f32 %v759_v55, %v419_v39  ;;  %v680_v63 = vadd.f32 %v679_v60, %v3062_v34  ;;  %v440_v39 = vpop.permute.xlu1 %439  ;;  %v447_v60 = vpop.permute.xlu0 %446 }
 0x170   : > { %v1813_v2 = vrot.slane %v1812_v57, 2  ;;  %v1817_v61 = vrot.slane %v790_v58, 4  ;;  %v760_v3 = vmax.f32 %v678_v59, 0.0  ;;  %v1809_v5 = vrot.slane %v1808_v51, 1 }
 0x171   : > { %v761_v7 = vmax.f32 %v680_v63, 0.0  ;;  %v683_v8 = vpop.f32.mrb[8].mxu0  ;;  %969 = vmatprep.mubr.f32.mxu1 %v791_v62 }
 0x172   : > { %v1814_v10 = vmax.f32 %v1812_v57, %v1813_v2  ;;  %v1818_v11 = vmax.f32 %v790_v58, %v1817_v61  ;;  %v792_v12 = vmul.f32 %v760_v3, %v426_v0  ;;  %v685_v14 = vpop.f32.mrb[9].mxu0  ;;  %970 = vmatmul.mubr.f32.gmra.mrb[4].mxu1 %v790_v58  ;;  %v684_v30 = vadd.f32 %v683_v8, %v3059_v16 }
 0x173   : > { %v793_v29 = vmul.f32 %v761_v7, %v426_v0  ;;  %v686_v9 = vadd.f32 %v685_v14, %v3062_v34  ;;  %v1810_v19 = vmax.f32 %v1808_v51, %v1809_v5 }
 0x174   : > { %v1815_v15 = vrot.slane %v1814_v10, 1  ;;  %v1819_v17 = vrot.slane %v1818_v11, 2  ;;  %v1823_v18 = vrot.slane %v792_v12, 4  ;;  %v762_v33 = vmax.f32 %v684_v30, 0.0 }
 0x175   : > { %v763_v20 = vmax.f32 %v686_v9, 0.0  ;;  %v689_v21 = vpop.f32.mrb[10].mxu0  ;;  %975 = vmatprep.mubr.f32.mxu1 %v793_v29  ;;  %v454_v9 = vpop.permute.xlu1 %453 }
 0x176   : > { %v1816_v24 = vmax.f32 %v1814_v10, %v1815_v15  ;;  %v1820_v6 = vmax.f32 %v1818_v11, %v1819_v17  ;;  %v1824_v26 = vmax.f32 %v792_v12, %v1823_v18  ;;  %v690_v31 = vadd.f32 %v689_v21, %v3059_v16  ;;  %v691_v32 = vpop.f32.mrb[11].mxu0  ;;  %976 = vmatmul.mubr.f32.gmra.mrb[6].mxu1 %v792_v12 }
 0x177   : > { %v794_v36 = vmul.f32 %v762_v33, %v433_v28  ;;  %v795_v37 = vmul.f32 %v763_v20, %v433_v28  ;;  %v692_v38 = vadd.f32 %v691_v32, %v3062_v34 }
 0x178   : > { %v1960_v41 = vsel %vm1506_vm1, %v1816_v24, %v1810_v19  ;;  %v1821_v42 = vrot.slane %v1820_v6, 1  ;;  %v1825_v44 = vrot.slane %v1824_v26, 2  ;;  %v764_v45 = vmax.f32 %v690_v31, 0.0 }
 0x179   : > { %v1829_v49 = vrot.slane %v794_v36, 4  ;;  %v765_v50 = vmax.f32 %v692_v38, 0.0  ;;  %v695_v47 = vpop.f32.mrb[12].mxu0  ;;  %981 = vmatprep.mubr.f32.mxu1 %v795_v37 }
 0x17a   : > { %v1822_v53 = vmax.f32 %v1820_v6, %v1821_v42  ;;  %v1826_v54 = vmax.f32 %v1824_v26, %v1825_v44  ;;  %v796_v55 = vmul.f32 %v764_v45, %v440_v39  ;;  %v696_v56 = vadd.f32 %v695_v47, %v3059_v16  ;;  %v697_v51 = vpop.f32.mrb[13].mxu0  ;;  %982 = vmatmul.mubr.f32.gmra.mrb[8].mxu1 %v794_v36  ;;  %v461_v44 = vpop.permute.xlu0 %460 }
 0x17b   : > { %v1830_v57 = vmax.f32 %v794_v36, %v1829_v49  ;;  %v797_v58 = vmul.f32 %v765_v50, %v440_v39  ;;  %v698_v59 = vadd.f32 %v697_v51, %v3062_v34 }
 0x17c   : > { %v1961_v62 = vsel %vm1508_vm2, %v1822_v53, %v1960_v41  ;;  %v1827_v63 = vrot.slane %v1826_v54, 1  ;;  %v1835_v0 = vrot.slane %v796_v55, 4  ;;  %v766_v2 = vmax.f32 %v696_v56, 0.0 }
 0x17d   : > { %v1831_v61 = vrot.slane %v1830_v57, 2  ;;  %v767_v3 = vmax.f32 %v698_v59, 0.0  ;;  %v701_v5 = vpop.f32.mrb[14].mxu0  ;;  %987 = vmatprep.mubr.f32.mxu1 %v797_v58  ;;  %v468_v59 = vpop.permute.xlu1 %467 }
 0x17e   : > { %v1828_v7 = vmax.f32 %v1826_v54, %v1827_v63  ;;  %v1836_v8 = vmax.f32 %v796_v55, %v1835_v0  ;;  %v798_v10 = vmul.f32 %v766_v2, %v447_v60  ;;  %v702_v11 = vadd.f32 %v701_v5, %v3059_v16  ;;  %v703_v12 = vpop.f32.mrb[15].mxu0  ;;  %988 = vmatmul.mubr.f32.gmra.mrb[10].mxu1 %v796_v55 }
 0x17f   : > { %v1832_v14 = vmax.f32 %v1830_v57, %v1831_v61  ;;  %v799_v29 = vmul.f32 %v767_v3, %v447_v60  ;;  %v704_v30 = vadd.f32 %v703_v12, %v3062_v34 }
 0x180   : > { %v1837_v15 = vrot.slane %v1836_v8, 2  ;;  %v1841_v17 = vrot.slane %v798_v10, 4  ;;  %v768_v18 = vmax.f32 %v702_v11, 0.0  ;;  %v1962_v28 = vsel %vm1510_vm3, %v1828_v7, %v1961_v62 }
 0x181   : > { %v1833_v19 = vrot.slane %v1832_v14, 1  ;;  %v769_v33 = vmax.f32 %v704_v30, 0.0  ;;  %v707_v20 = vpop.f32.mrb[16].mxu0  ;;  %993 = vmatprep.mubr.f32.mxu1 %v799_v29  ;;  %v475_v30 = vpop.permute.xlu0 %474 }
 0x182   : > { %v1838_v21 = vmax.f32 %v1836_v8, %v1837_v15  ;;  %v1842_v24 = vmax.f32 %v798_v10, %v1841_v17  ;;  %v800_v6 = vmul.f32 %v768_v18, %v454_v9  ;;  %v708_v26 = vadd.f32 %v707_v20, %v3059_v16  ;;  %v709_v31 = vpop.f32.mrb[17].mxu0  ;;  %994 = vmatmul.mubr.f32.gmra.mrb[12].mxu1 %v798_v10 }
 0x183   : > { %v1834_v32 = vmax.f32 %v1832_v14, %v1833_v19  ;;  %v801_v36 = vmul.f32 %v769_v33, %v454_v9  ;;  %v710_v37 = vadd.f32 %v709_v31, %v3062_v34 }
 0x184   : > { %v1839_v38 = vrot.slane %v1838_v21, 1  ;;  %v1843_v39 = vrot.slane %v1842_v24, 2  ;;  %v1847_v41 = vrot.slane %v800_v6, 4  ;;  %v770_v42 = vmax.f32 %v708_v26, 0.0 }
 0x185   : > { %v771_v45 = vmax.f32 %v710_v37, 0.0  ;;  %v713_v49 = vpop.f32.mrb[18].mxu0  ;;  %999 = vmatprep.mubr.f32.mxu1 %v801_v36  ;;  %v1963_v50 = vsel %vm1512_vm4, %v1834_v32, %v1962_v28  ;;  %v482_v37 = vpop.permute.xlu1 %481 }
 0x186   : > { %v1840_v47 = vmax.f32 %v1838_v21, %v1839_v38  ;;  %v1844_v53 = vmax.f32 %v1842_v24, %v1843_v39  ;;  %v1848_v54 = vmax.f32 %v800_v6, %v1847_v41  ;;  %v714_v55 = vadd.f32 %v713_v49, %v3059_v16  ;;  %v715_v56 = vpop.f32.mrb[19].mxu0  ;;  %1000 = vmatmul.mubr.f32.gmra.mrb[14].mxu1 %v800_v6 }
 0x187   : > { %v802_v51 = vmul.f32 %v770_v42, %v461_v44  ;;  %v803_v57 = vmul.f32 %v771_v45, %v461_v44  ;;  %v716_v58 = vadd.f32 %v715_v56, %v3062_v34 }
 0x188   : > { %v1845_v60 = vrot.slane %v1844_v53, 1  ;;  %v1849_v62 = vrot.slane %v1848_v54, 2  ;;  %v772_v63 = vmax.f32 %v714_v55, 0.0  ;;  %v1964_v0 = vsel %vm1514_vm5, %v1840_v47, %v1963_v50 }
 0x189   : > { %v1853_v2 = vrot.slane %v802_v51, 4  ;;  %v773_v61 = vmax.f32 %v716_v58, 0.0  ;;  %v719_v3 = vpop.f32.mrb[20].mxu0  ;;  %1005 = vmatprep.mubr.f32.mxu1 %v803_v57  ;;  %v489_v58 = vpop.permute.xlu0 %488 }
 0x18a   : > { %v1846_v5 = vmax.f32 %v1844_v53, %v1845_v60  ;;  %v1850_v7 = vmax.f32 %v1848_v54, %v1849_v62  ;;  %v720_v8 = vadd.f32 %v719_v3, %v3059_v16  ;;  %v804_v10 = vmul.f32 %v772_v63, %v468_v59  ;;  %v721_v11 = vpop.f32.mrb[21].mxu0  ;;  %1006 = vmatmul.mubr.f32.gmra.mrb[16].mxu1 %v802_v51 }
 0x18b   : > { %v1854_v12 = vmax.f32 %v802_v51, %v1853_v2  ;;  %v805_v14 = vmul.f32 %v773_v61, %v468_v59  ;;  %v722_v29 = vadd.f32 %v721_v11, %v3062_v34 }
 0x18c   : > { %v1851_v9 = vrot.slane %v1850_v7, 1  ;;  %v774_v15 = vmax.f32 %v720_v8, 0.0  ;;  %v1859_v17 = vrot.slane %v804_v10, 4  ;;  %v1965_v18 = vsel %vm1516_vm6, %v1846_v5, %v1964_v0 }
 0x18d   : > { %v1855_v28 = vrot.slane %v1854_v12, 2  ;;  %v775_v19 = vmax.f32 %v722_v29, 0.0  ;;  %v725_v33 = vpop.f32.mrb[22].mxu0  ;;  %1011 = vmatprep.mubr.f32.mxu1 %v805_v14 }
 0x18e   : > { %v1860_v20 = vmax.f32 %v804_v10, %v1859_v17  ;;  %v726_v21 = vadd.f32 %v725_v33, %v3059_v16  ;;  %v806_v24 = vmul.f32 %v774_v15, %v475_v30  ;;  %v727_v6 = vpop.f32.mrb[23].mxu0  ;;  %1012 = vmatmul.mubr.f32.gmra.mrb[18].mxu1 %v804_v10  ;;  %v1852_v26 = vmax.f32 %v1850_v7, %v1851_v9  ;;  %v496_v9 = vpop.permute.xlu1 %495 }
 0x18f   : > { %v1856_v31 = vmax.f32 %v1854_v12, %v1855_v28  ;;  %v807_v32 = vmul.f32 %v775_v19, %v475_v30  ;;  %v728_v36 = vadd.f32 %v727_v6, %v3062_v34 }
 0x190   : > { %v1861_v38 = vrot.slane %v1860_v20, 2  ;;  %v776_v39 = vmax.f32 %v726_v21, 0.0  ;;  %v1865_v41 = vrot.slane %v806_v24, 4  ;;  %v1966_v42 = vsel %vm1518_vm7, %v1852_v26, %v1965_v18 }
 0x191   : > { %v1857_v44 = vrot.slane %v1856_v31, 1  ;;  %v777_v45 = vmax.f32 %v728_v36, 0.0  ;;  %v731_v49 = vpop.f32.mrb[24].mxu0  ;;  %1017 = vmatprep.mubr.f32.mxu1 %v807_v32  ;;  %2041 = vmatmul.mubr.f32.vlgmr.msra.gmra.mrb[32].mxu0 %v1966_v42 }
 0x192   : > { %v1862_v50 = vmax.f32 %v1860_v20, %v1861_v38  ;;  %v1866_v47 = vmax.f32 %v806_v24, %v1865_v41  ;;  %v808_v53 = vmul.f32 %v776_v39, %v482_v37  ;;  %v732_v54 = vadd.f32 %v731_v49, %v3059_v16  ;;  %v733_v55 = vpop.f32.mrb[25].mxu0  ;;  %1018 = vmatmul.mubr.f32.gmra.mrb[20].mxu1 %v806_v24 }
 0x193   : > { %v1858_v56 = vmax.f32 %v1856_v31, %v1857_v44  ;;  %v809_v51 = vmul.f32 %v777_v45, %v482_v37  ;;  %v734_v57 = vadd.f32 %v733_v55, %v3062_v34  ;;  %2046 = vmatprep.mubr.f32.mxu0 %v2634_v1  ;;  %v503_v31 = vpop.permute.xlu0 %502  ;;  %v510_v55 = vpop.permute.xlu1 %509 }
 0x194   : > { %v1863_v59 = vrot.slane %v1862_v50, 1  ;;  %v1867_v60 = vrot.slane %v1866_v47, 2  ;;  %v1871_v62 = vrot.slane %v808_v53, 4  ;;  %v778_v63 = vmax.f32 %v732_v54, 0.0 }
 0x195   : > { %v779_v0 = vmax.f32 %v734_v57, 0.0  ;;  %v737_v2 = vpop.f32.mrb[26].mxu0  ;;  %1023 = vmatprep.mubr.f32.mxu1 %v809_v51 }
 0x196   : > { %v1864_v61 = vmax.f32 %v1862_v50, %v1863_v59  ;;  %v1868_v3 = vmax.f32 %v1866_v47, %v1867_v60  ;;  %v1872_v5 = vmax.f32 %v808_v53, %v1871_v62  ;;  %v810_v7 = vmul.f32 %v778_v63, %v489_v58  ;;  %v739_v8 = vpop.f32.mrb[27].mxu0  ;;  %1024 = vmatmul.mubr.f32.gmra.mrb[22].mxu1 %v808_v53 }
 0x197   : > { %v811_v10 = vmul.f32 %v779_v0, %v489_v58  ;;  %v738_v11 = vadd.f32 %v737_v2, %v3059_v16  ;;  %v740_v12 = vadd.f32 %v739_v8, %v3062_v34 }
 0x198   : > { %v1967_v1 = vsel %vm1506_vm1, %v1864_v61, %v1858_v56  ;;  %v1869_v14 = vrot.slane %v1868_v3, 1  ;;  %v1873_v29 = vrot.slane %v1872_v5, 2  ;;  %v1877_v30 = vrot.slane %v810_v7, 4 }
 0x199   : > { %v780_v15 = vmax.f32 %v738_v11, 0.0  ;;  %v781_v17 = vmax.f32 %v740_v12, 0.0  ;;  %v743_v18 = vpop.f32.mrb[28].mxu0  ;;  %1029 = vmatprep.mubr.f32.mxu1 %v811_v10 }
 0x19a   : > { %v1870_v28 = vmax.f32 %v1868_v3, %v1869_v14  ;;  %v1874_v19 = vmax.f32 %v1872_v5, %v1873_v29  ;;  %v1878_v33 = vmax.f32 %v810_v7, %v1877_v30  ;;  %v744_v20 = vadd.f32 %v743_v18, %v3059_v16  ;;  %v745_v21 = vpop.f32.mrb[29].mxu0  ;;  %1030 = vmatmul.mubr.f32.gmra.mrb[24].mxu1 %v810_v7 }
 0x19b   : > { %v812_v24 = vmul.f32 %v780_v15, %v496_v9  ;;  %v813_v6 = vmul.f32 %v781_v17, %v496_v9  ;;  %v746_v26 = vadd.f32 %v745_v21, %v3062_v34 }
 0x19c   : > { %v1875_v32 = vrot.slane %v1874_v19, 1  ;;  %v1879_v36 = vrot.slane %v1878_v33, 2  ;;  %v782_v37 = vmax.f32 %v744_v20, 0.0  ;;  %v1968_v38 = vsel %vm1508_vm2, %v1870_v28, %v1967_v1 }
 0x19d   : > { %v1883_v39 = vrot.slane %v812_v24, 4  ;;  %v783_v41 = vmax.f32 %v746_v26, 0.0  ;;  %v749_v42 = vpop.f32.mrb[30].mxu0  ;;  %1035 = vmatprep.mubr.f32.mxu1 %v813_v6  ;;  %v2636_v28 = vmov 0  }
 0x19e   : > { %v1876_v44 = vmax.f32 %v1874_v19, %v1875_v32  ;;  %v1880_v45 = vmax.f32 %v1878_v33, %v1879_v36  ;;  %v814_v49 = vmul.f32 %v782_v37, %v503_v31  ;;  %v750_v50 = vadd.f32 %v749_v42, %v3059_v16  ;;  %1036 = vmatmul.mubr.f32.gmra.mrb[26].mxu1 %v812_v24  ;;  %v751_v47 = vpop.f32.mrb[31].mxu0  ;;  %v2250_v19 = vld [vmem:[%s3486_s5 + $0x1] ss:$8 sm:$0x3] }
 0x19f   : > { %v1884_v53 = vmax.f32 %v812_v24, %v1883_v39  ;;  %v815_v54 = vmul.f32 %v783_v41, %v503_v31  ;;  %v752_v56 = vadd.f32 %v751_v47, %v3062_v34  ;;  %2459 = vset.pattern.permute.xlu1 %v2636_v28  ;;  %2460 = vset.pattern.permute.xlu0 %v2636_v28  ;;  %v3125_v31 = vld [vmem:[%s3486_s5 + $0x2] ss:$0 sm:$0xff] }
 0x1a0   : > { %v1881_v51 = vrot.slane %v1880_v45, 1  ;;  %v1889_v57 = vrot.slane %v814_v49, 4  ;;  %v784_v58 = vmax.f32 %v750_v50, 0.0  ;;  %v1969_v59 = vsel %vm1510_vm3, %v1876_v44, %v1968_v38  ;;  %v3133_v44 = vld [vmem:[%s3486_s5 + $0x3] ss:$0 sm:$0xff] }
 0x1a1   : > { %v1885_v60 = vrot.slane %v1884_v53, 2  ;;  %1041 = vmatprep.mubr.f32.mxu1 %v815_v54  ;;  %v785_v62 = vmax.f32 %v752_v56, 0.0  ;;  %v3115_v33 = vrot.slane %v2250_v19, %v2898_v22  ;;  %v3118_v20 = vrot.slane %v2250_v19, %v2904_v25 }
 0x1a2   : > { %v1882_v63 = vmax.f32 %v1880_v45, %v1881_v51  ;;  %v1890_v0 = vmax.f32 %v814_v49, %v1889_v57  ;;  %v816_v2 = vmul.f32 %v784_v58, %v510_v55  ;;  %1042 = vmatmul.mubr.f32.gmra.mrb[28].mxu1 %v814_v49 }
 0x1a3   : > { %v1886_v16 = vmax.f32 %v1884_v53, %v1885_v60  ;;  %v817_v61 = vmul.f32 %v785_v62, %v510_v55 }
 0x1a4   : > { %v1891_v3 = vrot.slane %v1890_v0, 2  ;;  %v1895_v5 = vrot.slane %v816_v2, 4  ;;  %v1970_v7 = vsel %vm1512_vm4, %v1882_v63, %v1969_v59 }
 0x1a5   : > { %v1887_v8 = vrot.slane %v1886_v16, 1  ;;  %1047 = vmatprep.mubr.f32.mxu1 %v817_v61 }
 0x1a6   : > { %v1892_v34 = vmax.f32 %v1890_v0, %v1891_v3  ;;  %v1896_v10 = vmax.f32 %v816_v2, %v1895_v5  ;;  %1048 = vmatmul.mubr.f32.gmra.mrb[30].mxu1 %v816_v2 }
 0x1a7   : > { %v1888_v11 = vmax.f32 %v1886_v16, %v1887_v8 }
 0x1a8   : > { %v1897_v12 = vrot.slane %v1896_v10, 2  ;;  %v1893_v1 = vrot.slane %v1892_v34, 1 }
 0x1a9   : > { %v1971_v14 = vsel %vm1514_vm5, %v1888_v11, %v1970_v7 }
 0x1aa   : > { %v1894_v29 = vmax.f32 %v1892_v34, %v1893_v1  ;;  %v1898_v30 = vmax.f32 %v1896_v10, %v1897_v12 }
 0x1ac   : > { %v1899_v9 = vrot.slane %v1898_v30, 1  ;;  %v1972_v15 = vsel %vm1516_vm6, %v1894_v29, %v1971_v14 }
 0x1ae   : > { %v1900_v17 = vmax.f32 %v1898_v30, %v1899_v9 }
 0x1b0   : > { %v1973_v18 = vsel %vm1518_vm7, %v1900_v17, %v1972_v15 }
 0x1b1   : > { %2047 = vmatmul.mubr.f32.gmra.mrb[34].mxu0 %v1973_v18 }
 0x23d   : > { %v959_v21 = vpop.f32.mrb[0].mxu1 }
 0x23e   : > { %v960_v24 = vadd.f32 %v959_v21, %v3115_v33  ;;  %v961_v6 = vpop.f32.mrb[1].mxu1 }
 0x23f   : > { %v962_v26 = vadd.f32 %v961_v6, %v3118_v20 }
 0x240   : > { %v1054_v32 = vmax.f32 %v960_v24, 0.0 }
 0x241   : > { %v965_v36 = vpop.f32.mrb[2].mxu1  ;;  %v1055_v37 = vmax.f32 %v962_v26, 0.0 }
 0x242   : > { %v966_v38 = vadd.f32 %v965_v36, %v3115_v33  ;;  %v967_v39 = vpop.f32.mrb[3].mxu1  ;;  %v1086_v41 = vmul.f32 %v1054_v32, %v3125_v31 }
 0x243   : > { %v968_v42 = vadd.f32 %v967_v39, %v3118_v20  ;;  %v1155_v54 = vmul.f32 %v1055_v37, %v3133_v44  ;;  %v2251_v39 = vld [vmem:[%s3486_s5 + $0x4] ss:$8 sm:$0x3] }
 0x244   : > { %v1056_v45 = vmax.f32 %v966_v38, 0.0  ;;  %1102 = vadd.xlane.f32.xlu0 %v1086_v41 }
 0x245   : > { %v971_v49 = vpop.f32.mrb[4].mxu1  ;;  %v1057_v50 = vmax.f32 %v968_v42, 0.0 }
 0x246   : > { %v972_v47 = vadd.f32 %v971_v49, %v3115_v33  ;;  %v973_v53 = vpop.f32.mrb[5].mxu1  ;;  %v1087_v55 = vmul.f32 %v1056_v45, %v3125_v31  ;;  %v2252_v45 = vld [vmem:[%s3486_s5 + $0x5] ss:$8 sm:$0x3] }
 0x247   : > { %v974_v57 = vadd.f32 %v973_v53, %v3118_v20  ;;  %v1156_v59 = vmul.f32 %v1057_v50, %v3133_v44 }
 0x248   : > { %1171 = vadd.xlane.f32.xlu0 %v1155_v54  ;;  %1104 = vadd.xlane.f32.xlu1 %v1087_v55  ;;  %v1058_v51 = vmax.f32 %v972_v47, 0.0  ;;  %v3165_v47 = vrot.slane %v2251_v39, %v2898_v22 }
 0x249   : > { %v977_v56 = vpop.f32.mrb[6].mxu1  ;;  %v1059_v62 = vmax.f32 %v974_v57, 0.0 }
 0x24a   : > { %v979_v58 = vpop.f32.mrb[7].mxu1  ;;  %v978_v63 = vadd.f32 %v977_v56, %v3115_v33  ;;  %v1088_v2 = vmul.f32 %v1058_v51, %v3125_v31  ;;  %v3169_v56 = vrot.slane %v2251_v39, %v2904_v25 }
 0x24b   : > { %v980_v34 = vadd.f32 %v979_v58, %v3118_v20  ;;  %v1157_v11 = vmul.f32 %v1059_v62, %v3133_v44  ;;  %v3173_v58 = vrot.slane %v2252_v45, %v2898_v22 }
 0x24c   : > { %1173 = vadd.xlane.f32.xlu0 %v1156_v59  ;;  %v1060_v8 = vmax.f32 %v978_v63, 0.0 }
 0x24d   : > { %v983_v60 = vpop.f32.mrb[8].mxu1  ;;  %v1061_v29 = vmax.f32 %v980_v34, 0.0 }
 0x24e   : > { %v984_v0 = vadd.f32 %v983_v60, %v3115_v33  ;;  %v985_v16 = vpop.f32.mrb[9].mxu1  ;;  %v1089_v9 = vmul.f32 %v1060_v8, %v3125_v31  ;;  %v3176_v60 = vrot.slane %v2252_v45, %v2904_v25 }
 0x24f   : > { %v986_v61 = vadd.f32 %v985_v16, %v3118_v20  ;;  %v1158_v24 = vmul.f32 %v1061_v29, %v3133_v44 }
 0x250   : > { %v1062_v3 = vmax.f32 %v984_v0, 0.0  ;;  %1106 = vadd.xlane.f32.xlu0 %v1088_v2 }
 0x251   : > { %v1063_v5 = vmax.f32 %v986_v61, 0.0  ;;  %v989_v7 = vpop.f32.mrb[10].mxu1 }
 0x252   : > { %v1090_v10 = vmul.f32 %v1062_v3, %v3125_v31  ;;  %v991_v12 = vpop.f32.mrb[11].mxu1  ;;  %v990_v30 = vadd.f32 %v989_v7, %v3115_v33 }
 0x253   : > { %v1159_v1 = vmul.f32 %v1063_v5, %v3133_v44  ;;  %v992_v21 = vadd.f32 %v991_v12, %v3118_v20 }
 0x254   : > { %1110 = vadd.xlane.f32.xlu1 %v1090_v10  ;;  %1175 = vadd.xlane.f32.xlu0 %v1157_v11  ;;  %v1064_v19 = vmax.f32 %v990_v30, 0.0 }
 0x255   : > { %v995_v14 = vpop.f32.mrb[12].mxu1  ;;  %v1065_v36 = vmax.f32 %v992_v21, 0.0 }
 0x256   : > { %v996_v15 = vadd.f32 %v995_v14, %v3115_v33  ;;  %v997_v17 = vpop.f32.mrb[13].mxu1  ;;  %v1091_v38 = vmul.f32 %v1064_v19, %v3125_v31 }
 0x257   : > { %v998_v37 = vadd.f32 %v997_v17, %v3118_v20  ;;  %v1160_v55 = vmul.f32 %v1065_v36, %v3133_v44 }
 0x258   : > { %1179 = vadd.xlane.f32.xlu1 %v1159_v1  ;;  %1108 = vadd.xlane.f32.xlu0 %v1089_v9  ;;  %v1066_v18 = vmax.f32 %v996_v15, 0.0 }
 0x259   : > { %v1001_v28 = vpop.f32.mrb[14].mxu1  ;;  %v1067_v54 = vmax.f32 %v998_v37, 0.0 }
 0x25a   : > { %v1003_v6 = vpop.f32.mrb[15].mxu1  ;;  %v1092_v26 = vmul.f32 %v1066_v18, %v3125_v31  ;;  %v1002_v50 = vadd.f32 %v1001_v28, %v3115_v33 }
 0x25b   : > { %v1004_v63 = vadd.f32 %v1003_v6, %v3118_v20  ;;  %v1161_v3 = vmul.f32 %v1067_v54, %v3133_v44 }
 0x25c   : > { %1177 = vadd.xlane.f32.xlu0 %v1158_v24  ;;  %1114 = vadd.xlane.f32.xlu1 %v1092_v26  ;;  %v1068_v62 = vmax.f32 %v1002_v50, 0.0 }
 0x25d   : > { %v1007_v32 = vpop.f32.mrb[16].mxu1  ;;  %v1069_v11 = vmax.f32 %v1004_v63, 0.0 }
 0x25e   : > { %v1008_v41 = vadd.f32 %v1007_v32, %v3115_v33  ;;  %v1009_v42 = vpop.f32.mrb[17].mxu1  ;;  %v1093_v12 = vmul.f32 %v1068_v62, %v3125_v31 }
 0x25f   : > { %v1010_v14 = vadd.f32 %v1009_v42, %v3118_v20  ;;  %v1162_v19 = vmul.f32 %v1069_v11, %v3133_v44 }
 0x260   : > { %1112 = vadd.xlane.f32.xlu0 %v1091_v38  ;;  %v1070_v49 = vmax.f32 %v1008_v41, 0.0 }
 0x261   : > { %v1013_v53 = vpop.f32.mrb[18].mxu1  ;;  %v1071_v24 = vmax.f32 %v1010_v14, 0.0 }
 0x262   : > { %v1015_v51 = vpop.f32.mrb[19].mxu1  ;;  %v1094_v57 = vmul.f32 %v1070_v49, %v3125_v31  ;;  %v1014_v6 = vadd.f32 %v1013_v53, %v3115_v33 }
 0x263   : > { %v1016_v41 = vadd.f32 %v1015_v51, %v3118_v20  ;;  %v1163_v53 = vmul.f32 %v1071_v24, %v3133_v44 }
 0x264   : > { %v2042_v59 = vpop.f32.mrb[32].mxu0  ;;  %1181 = vadd.xlane.f32.xlu0 %v1160_v55  ;;  %1118 = vadd.xlane.f32.xlu1 %v1094_v57  ;;  %v1072_v49 = vmax.f32 %v1014_v6, 0.0 }
 0x265   : > { %v2043_v0 = vadd.f32 %v2042_v59, %v3165_v47  ;;  %v2044_v2 = vpop.f32.mrb[33].mxu0  ;;  %v1019_v16 = vpop.f32.mrb[20].mxu1  ;;  %v1073_v63 = vmax.f32 %v1016_v41, 0.0 }
 0x266   : > { %v2045_v61 = vadd.f32 %v2044_v2, %v3169_v56  ;;  %v1020_v5 = vadd.f32 %v1019_v16, %v3115_v33  ;;  %v1021_v7 = vpop.f32.mrb[21].mxu1 }
 0x267   : > { %v2064_v8 = vmul.f32 %v3173_v58, %v2043_v0  ;;  %v1022_v2 = vadd.f32 %v1021_v7, %v3118_v20  ;;  %v1164_v7 = vmul.f32 %v1073_v63, %v3133_v44 }
 0x268   : > { %v2065_v34 = vmul.f32 %v3176_v60, %v2045_v61  ;;  %1183 = vadd.xlane.f32.xlu0 %v1161_v3  ;;  %v1074_v10 = vmax.f32 %v1020_v5, 0.0  ;;  %v1095_v61 = vmul.f32 %v1072_v49, %v3125_v31 }
 0x269   : > { %v1025_v1 = vpop.f32.mrb[22].mxu1 }
 0x26a   : > { %v1026_v29 = vadd.f32 %v1025_v1, %v3115_v33  ;;  %v1027_v30 = vpop.f32.mrb[23].mxu1  ;;  %v1096_v9 = vmul.f32 %v1074_v10, %v3125_v31  ;;  %v3189_v15 = vadd.f32 %v2065_v34, %v2064_v8  ;;  %v1075_v1 = vmax.f32 %v1022_v2, 0.0 }
 0x26b   : > { %v1028_v17 = vadd.f32 %v1027_v30, %v3118_v20 }
 0x26c   : > { %1116 = vadd.xlane.f32.xlu0 %v1093_v12  ;;  %v1076_v18 = vmax.f32 %v1026_v29, 0.0  ;;  %1122 = vadd.xlane.f32.xlu1 %v1096_v9 }
 0x26d   : > { %v1077_v28 = vmax.f32 %v1028_v17, 0.0  ;;  %v1031_v21 = vpop.f32.mrb[24].mxu1 }
 0x26e   : > { %v1032_v26 = vadd.f32 %v1031_v21, %v3115_v33  ;;  %v1033_v32 = vpop.f32.mrb[25].mxu1  ;;  %v1097_v36 = vmul.f32 %v1076_v18, %v3125_v31 }
 0x26f   : > { %v1034_v37 = vadd.f32 %v1033_v32, %v3118_v20  ;;  %v1166_v38 = vmul.f32 %v1077_v28, %v3133_v44 }
 0x270   : > { %1185 = vadd.xlane.f32.xlu0 %v1162_v19  ;;  %v1078_v39 = vmax.f32 %v1032_v26, 0.0  ;;  %v1165_v19 = vmul.f32 %v1075_v1, %v3133_v44 }
 0x271   : > { %v1079_v42 = vmax.f32 %v1034_v37, 0.0  ;;  %v1037_v45 = vpop.f32.mrb[26].mxu1 }
 0x272   : > { %v1038_v50 = vadd.f32 %v1037_v45, %v3115_v33  ;;  %v1039_v54 = vpop.f32.mrb[27].mxu1  ;;  %v1098_v55 = vmul.f32 %v1078_v39, %v3125_v31 }
 0x273   : > { %v1040_v57 = vadd.f32 %v1039_v54, %v3118_v20  ;;  %v1167_v59 = vmul.f32 %v1079_v42, %v3133_v44 }
 0x274   : > { %v1080_v62 = vmax.f32 %v1038_v50, 0.0  ;;  %1187 = vadd.xlane.f32.xlu0 %v1163_v53  ;;  %1126 = vadd.xlane.f32.xlu1 %v1098_v55 }
 0x275   : > { %v1081_v0 = vmax.f32 %v1040_v57, 0.0  ;;  %v1043_v51 = vpop.f32.mrb[28].mxu1 }
 0x276   : > { %v1044_v16 = vadd.f32 %v1043_v51, %v3115_v33  ;;  %v1045_v3 = vpop.f32.mrb[29].mxu1  ;;  %v1099_v5 = vmul.f32 %v1080_v62, %v3125_v31 }
 0x277   : > { %v1046_v8 = vadd.f32 %v1045_v3, %v3118_v20  ;;  %v1168_v34 = vmul.f32 %v1081_v0, %v3133_v44 }
 0x278   : > { %v1082_v10 = vmax.f32 %v1044_v16, 0.0  ;;  %1120 = vadd.xlane.f32.xlu0 %v1095_v61 }
 0x279   : > { %v1083_v11 = vmax.f32 %v1046_v8, 0.0  ;;  %v1049_v12 = vpop.f32.mrb[30].mxu1 }
 0x27a   : > { %v1100_v14 = vmul.f32 %v1082_v10, %v3125_v31  ;;  %v1050_v29 = vadd.f32 %v1049_v12, %v3115_v33  ;;  %v1051_v30 = vpop.f32.mrb[31].mxu1 }
 0x27b   : > { %v1052_v9 = vadd.f32 %v1051_v30, %v3118_v20  ;;  %v1169_v17 = vmul.f32 %v1083_v11, %v3133_v44 }
 0x27c   : > { %1130 = vadd.xlane.f32.xlu1 %v1100_v14  ;;  %1189 = vadd.xlane.f32.xlu0 %v1164_v7  ;;  %v1084_v18 = vmax.f32 %v1050_v29, 0.0 }
 0x27d   : > { %v1085_v28 = vmax.f32 %v1052_v9, 0.0 }
 0x27e   : > { %v1101_v21 = vmul.f32 %v1084_v18, %v3125_v31  ;;  %v1231_v31 = vpop.permute.xlu0 %1230 }
 0x27f   : > { %v1170_v24 = vmul.f32 %v1085_v28, %v3133_v44 }
 0x280   : > { %1199 = vadd.xlane.f32.xlu1 %v1169_v17  ;;  %1191 = vadd.xlane.f32.xlu0 %v1165_v19 }
 0x282   : > { %v3226_v44 = vpop.permute.xlu0 %1286 }
 0x284   : > { %v2048_v6 = vpop.f32.mrb[34].mxu0  ;;  %1124 = vadd.xlane.f32.xlu0 %v1097_v36 }
 0x285   : > { %v2049_v33 = vadd.f32 %v2048_v6, %v3165_v47  ;;  %v2050_v20 = vpop.f32.mrb[35].mxu0  ;;  %v3228_v47 = vpop.permute.xlu1 %1204 }
 0x286   : > { %v2051_v26 = vadd.f32 %v2050_v20, %v3169_v56  ;;  %v3231_v56 = vld [vmem:[%s2895_s30] sm:$0xff] }
 0x287   : > { %v2066_v32 = vmul.f32 %v3173_v58, %v2049_v33  ;;  %v1370_v58 = vsel %vm1369_vm8, %v3231_v56, 0.0  ;;  %vm1655_vm9 = vcmp.gt.f32.partialorder %v3231_v56, 0.0 }
 0x288   : > { %v2067_v37 = vmul.f32 %v3176_v60, %v2051_v26  ;;  %1193 = vadd.xlane.f32.xlu0 %v1166_v38  ;;  %v1252_v60 = vpop.permute.xlu0 %1251 }
 0x289   : > { %v1238_v36 = vpop.permute.xlu1 %1237 }
 0x28a   : > { %v3222_v39 = vadd.f32 %v2067_v37, %v2066_v32 }
 0x28c   : > { %1195 = vadd.xlane.f32.xlu0 %v1167_v59  ;;  %v1259_v38 = vpop.permute.xlu0 %1258 }
 0x28d   : > { %v1245_v41 = vpop.permute.xlu1 %1244 }
 0x290   : > { %1128 = vadd.xlane.f32.xlu0 %v1099_v5 }
 0x291   : > { %1328 = vbcast.lane.b32.xlu1 %v2998_v43, 256  ;;  %v1266_v43 = vpop.permute.xlu0 %1265  ;;  %v1294_v42 = vpop.permute.xlu1 %1293 }
 0x294   : > { %1197 = vadd.xlane.f32.xlu0 %v1168_v34 }
 0x295   : > { %v1301_v45 = vpop.permute.xlu1 %1300 }
 0x299   : > { %v1308_v50 = vpop.permute.xlu1 %1307 }
 0x29d   : > { %v3238_v53 = vpop.permute.xlu1 %1314 }
 0x2a1   : > { %v3240_v59 = vpop.permute.xlu1 %1321 }
 0x2aa   : > { %1335 = vbcast.lane.b32.xlu0 %v3002_v46, 256  ;;  %v1273_v46 = vpop.permute.xlu0 %1272 }
 0x2ae   : > { %v1280_v49 = vpop.permute.xlu0 %1279 }
 0x2b5   : > { %1371 = vadd.xlane.f32.xlu1 %v1370_v58 }
 0x2c6   : > { %1136 = vperm.xlu1 %2459, %v3045_v13  }
 0x2c9   : > { %1132 = vadd.xlane.f32.xlu0 %v1101_v21 }
 0x2cd   : > { %1201 = vadd.xlane.f32.xlu0 %v1170_v24 }
 0x2d1   : > { %v3236_v54 = vpop.xlane.xlu0 %1102 }
 0x2d5   : > { %v1172_v55 = vpop.xlane.xlu0 %1171  ;;  %v3245_v0 = vpop.xlane.xlu1 %1104 }
 0x2d6   : > { %v1207_v62 = vadd.f32 %v3228_v47, %v1172_v55 }
 0x2d8   : > { %v3247_v13 = vmul.f32 %v1231_v31, %v1207_v62 }
 0x2d9   : > { %v1174_v57 = vpop.xlane.xlu0 %1173 }
 0x2da   : > { %v1208_v51 = vadd.f32 %v3228_v47, %v1174_v57 }
 0x2dc   : > { %v3253_v61 = vmul.f32 %v1238_v36, %v1208_v51 }
 0x2dd   : > { %v3243_v63 = vpop.xlane.xlu0 %1106 }
 0x2e1   : > { %v1176_v2 = vpop.xlane.xlu0 %1175  ;;  %v3251_v16 = vpop.xlane.xlu1 %1110 }
 0x2e2   : > { %v1209_v3 = vadd.f32 %v3228_v47, %v1176_v2 }
 0x2e3   : > { %1393 = vperm.xlu0 %2460, %v3247_v13  }
 0x2e4   : > { %v3259_v8 = vmul.f32 %v1245_v41, %v1209_v3 }
 0x2e5   : > { %v3256_v5 = vpop.xlane.xlu0 %1108  ;;  %v1180_v10 = vpop.xlane.xlu1 %1179 }
 0x2e6   : > { %v1211_v1 = vadd.f32 %v3228_v47, %v1180_v10 }
 0x2e7   : > { %1396 = vperm.xlu0 %2460, %v3253_v61  }
 0x2e8   : > { %v3269_v7 = vmul.f32 %v1259_v38, %v1211_v1 }
 0x2e9   : > { %v1178_v34 = vpop.xlane.xlu0 %1177  ;;  %v3287_v26 = vpop.xlane.xlu1 %1114 }
 0x2ea   : > { %v1210_v11 = vadd.f32 %v3228_v47, %v1178_v34 }
 0x2eb   : > { %1399 = vperm.xlu0 %2460, %v3259_v8  }
 0x2ec   : > { %v3263_v12 = vmul.f32 %v1252_v60, %v1210_v11 }
 0x2ed   : > { %v3266_v14 = vpop.xlane.xlu0 %1112 }
 0x2ef   : > { %1402 = vperm.xlu0 %2460, %v3263_v12  }
 0x2f1   : > { %v1182_v29 = vpop.xlane.xlu0 %1181  ;;  %v3293_v31 = vpop.xlane.xlu1 %1118 }
 0x2f2   : > { %v1212_v30 = vadd.f32 %v3228_v47, %v1182_v29 }
 0x2f3   : > { %1405 = vperm.xlu0 %2460, %v3269_v7  }
 0x2f4   : > { %v3273_v9 = vmul.f32 %v1266_v43, %v1212_v30 }
 0x2f5   : > { %v1184_v17 = vpop.xlane.xlu0 %1183 }
 0x2f6   : > { %v1213_v18 = vadd.f32 %v3228_v47, %v1184_v17 }
 0x2f7   : > { %1408 = vperm.xlu0 %2460, %v3273_v9  }
 0x2f8   : > { %v3277_v28 = vmul.f32 %v1273_v46, %v1213_v18 }
 0x2f9   : > { %v3279_v19 = vpop.xlane.xlu0 %1116  ;;  %v1123_v38 = vpop.xlane.xlu1 %1122 }
 0x2fb   : > { %1411 = vperm.xlu0 %2460, %v3277_v28  }
 0x2fd   : > { %v1186_v21 = vpop.xlane.xlu0 %1185 }
 0x2fe   : > { %v1214_v24 = vadd.f32 %v3228_v47, %v1186_v21  ;;  %v3308_v21 = vld [vmem:[%s2895_s30 + $0x8] sm:$0xff] }
 0x2ff   : > { %vm1656_vm10 = vcmp.gt.f32.partialorder %v3308_v21, 0.0 }
 0x300   : > { %v3283_v6 = vmul.f32 %v1280_v49, %v1214_v24 }
 0x301   : > { %v1188_v33 = vpop.xlane.xlu0 %1187  ;;  %v1127_v55 = vpop.xlane.xlu1 %1126 }
 0x302   : > { %v1215_v20 = vadd.f32 %v3228_v47, %v1188_v33  ;;  %1414 = vperm.xlu1 %2459, %v3283_v6  }
 0x304   : > { %v3290_v32 = vmul.f32 %v3226_v44, %v1215_v20 }
 0x305   : > { %v1121_v37 = vpop.xlane.xlu0 %1120 }
 0x306   : > { %1417 = vperm.xlu0 %2460, %v3290_v32  }
 0x309   : > { %v1190_v58 = vpop.xlane.xlu0 %1189  ;;  %v1131_v51 = vpop.xlane.xlu1 %1130 }
 0x30a   : > { %v1216_v60 = vadd.f32 %v3228_v47, %v1190_v58 }
 0x30c   : > { %v1362_v36 = vmul.f32 %v1294_v42, %v1216_v60 }
 0x30d   : > { %v1192_v41 = vpop.xlane.xlu0 %1191  ;;  %v1200_v10 = vpop.xlane.xlu1 %1199 }
 0x30e   : > { %v1217_v43 = vadd.f32 %v3228_v47, %v1192_v41  ;;  %1420 = vperm.xlu0 %2460, %v1362_v36   ;;  %v1221_v30 = vadd.f32 %v3228_v47, %v1200_v10 }
 0x310   : > { %v1363_v46 = vmul.f32 %v1301_v45, %v1217_v43 }
 0x311   : > { %v1125_v49 = vpop.xlane.xlu0 %1124  ;;  %v1329_v29 = vpop.permute.xlu1 %1328 }
 0x312   : > { %1423 = vperm.xlu0 %2460, %v1363_v46  }
 0x315   : > { %v1194_v44 = vpop.xlane.xlu0 %1193 }
 0x316   : > { %v1218_v57 = vadd.f32 %v3228_v47, %v1194_v44 }
 0x318   : > { %v1364_v62 = vmul.f32 %v1308_v50, %v1218_v57  ;;  %v1367_v50 = vmul.f32 %v1329_v29, %v1221_v30 }
 0x319   : > { %v1196_v2 = vpop.xlane.xlu0 %1195 }
 0x31a   : > { %v1219_v3 = vadd.f32 %v3228_v47, %v1196_v2  ;;  %1426 = vperm.xlu1 %2459, %v1364_v62  }
 0x31c   : > { %v1365_v42 = vmul.f32 %v3238_v53, %v1219_v3  ;;  %v1373_v53 = vsel %vm1369_vm8, %v3308_v21, 0.0 }
 0x31d   : > { %v1129_v34 = vpop.xlane.xlu0 %1128 }
 0x31e   : > { %1429 = vperm.xlu0 %2460, %v1365_v42  }
 0x321   : > { %v1198_v11 = vpop.xlane.xlu0 %1197 }
 0x322   : > { %v1220_v45 = vadd.f32 %v3228_v47, %v1198_v11 }
 0x324   : > { %v1366_v1 = vmul.f32 %v3240_v59, %v1220_v45 }
 0x325   : > { %v1336_v2 = vpop.permute.xlu0 %1335 }
 0x326   : > { %1432 = vperm.xlu0 %2460, %v1366_v1  }
 0x32a   : > { %1435 = vperm.xlu0 %2460, %v1367_v50  }
 0x342   : > { %v3303_v17 = vpop.xlane.xlu1 %1371 }
 0x346   : > { %v3305_v18 = vpop.permute.xlu1 %1136 }
 0x347   : > { %v1148_v24 = vadd.f32 %v3305_v18, %v1121_v37  ;;  %v1149_v59 = vadd.f32 %v3305_v18, %v1123_v38  ;;  %v1150_v20 = vadd.f32 %v3305_v18, %v1125_v49  ;;  %v1151_v58 = vadd.f32 %v3305_v18, %v1127_v55 }
 0x348   : > { %v1152_v60 = vadd.f32 %v3305_v18, %v1129_v34  ;;  %v1153_v41 = vadd.f32 %v3305_v18, %v1131_v51 }
 0x349   : > { %1374 = vadd.xlane.f32.xlu0 %v1373_v53  ;;  %v3313_v33 = vadd.f32 %v1362_v36, %v1148_v24  ;;  %v3320_v43 = vadd.f32 %v1363_v46, %v1149_v59  ;;  %v3322_v44 = vadd.f32 %v1364_v62, %v1150_v20  ;;  %v3324_v57 = vadd.f32 %v1365_v42, %v1151_v58 }
 0x34a   : > { %v3326_v37 = vadd.f32 %v1366_v1, %v1152_v60  ;;  %v3328_v36 = vadd.f32 %v1367_v50, %v1153_v41 }
 0x356   : > { %v1133_v38 = vpop.xlane.xlu0 %1132 }
 0x357   : > { %v1154_v49 = vadd.f32 %v3305_v18, %v1133_v38 }
 0x35a   : > { %v1202_v3 = vpop.xlane.xlu0 %1201 }
 0x35b   : > { %v1222_v55 = vadd.f32 %v3228_v47, %v1202_v3 }
 0x35d   : > { %v1368_v34 = vmul.f32 %v1336_v2, %v1222_v55 }
 0x35f   : > { %v3332_v10 = vadd.f32 %v1368_v34, %v1154_v49  ;;  %1438 = vperm.xlu1 %2459, %v1368_v34  }
 0x362   : > { %v1394_v46 = vpop.permute.xlu0 %1393 }
 0x363   : > { %v1445_v30 = vrot.slane %v1394_v46, %v2887_v4 }
 0x366   : > { %v1397_v62 = vpop.permute.xlu0 %1396 }
 0x367   : > { %v1449_v1 = vrot.slane %v1397_v62, %v2887_v4 }
 0x369   : > { %v1507_v24 = vsel %vm1506_vm1, %v1449_v1, %v1445_v30 }
 0x36a   : > { %v1400_v51 = vpop.permute.xlu0 %1399 }
 0x36b   : > { %v1453_v29 = vrot.slane %v1400_v51, %v2887_v4 }
 0x36d   : > { %v1509_v20 = vsel %vm1508_vm2, %v1453_v29, %v1507_v24 }
 0x36e   : > { %v1403_v42 = vpop.permute.xlu0 %1402 }
 0x36f   : > { %v1457_v50 = vrot.slane %v1403_v42, %v2887_v4 }
 0x371   : > { %v1511_v60 = vsel %vm1510_vm3, %v1457_v50, %v1509_v20 }
 0x372   : > { %v1406_v11 = vpop.permute.xlu0 %1405 }
 0x373   : > { %v1461_v47 = vrot.slane %v1406_v11, %v2887_v4 }
 0x375   : > { %v1513_v41 = vsel %vm1512_vm4, %v1461_v47, %v1511_v60 }
 0x376   : > { %v1409_v45 = vpop.permute.xlu0 %1408 }
 0x377   : > { %v1465_v59 = vrot.slane %v1409_v45, %v2887_v4 }
 0x379   : > { %v1515_v38 = vsel %vm1514_vm5, %v1465_v59, %v1513_v41 }
 0x37a   : > { %v1412_v53 = vpop.permute.xlu0 %1411 }
 0x37b   : > { %v1469_v58 = vrot.slane %v1412_v53, %v2887_v4 }
 0x37d   : > { %v1517_v3 = vsel %vm1516_vm6, %v1469_v58, %v1515_v38 }
 0x381   : > { %v1415_v2 = vpop.permute.xlu1 %1414 }
 0x382   : > { %v1473_v49 = vrot.slane %v1415_v2, %v2887_v4 }
 0x384   : > { %v1519_v55 = vsel %vm1518_vm7, %v1473_v49, %v1517_v3 }
 0x385   : > { %v1529_v34 = vsel %vm1369_vm8, %v1519_v55, 0.0  ;;  %v1418_v46 = vpop.permute.xlu0 %1417 }
 0x386   : > { %1530 = vadd.xlane.f32.xlu1 %v1529_v34  ;;  %v1477_v30 = vrot.slane %v1418_v46, %v2887_v4  ;;  %v1535_v34 = vmax.f32 %v3303_v17, 1.0  ;;  %v1140_v46 = vadd.f32 %v3305_v18, %v3245_v0  ;;  %v1145_v17 = vadd.f32 %v3305_v18, %v3287_v26 }
 0x388   : > { %2461 = vrcp.f32 %v1535_v34  ;;  %v1547_v26 = vadd.f32 %v3277_v28, %v1145_v17 }
 0x38a   : > { %2072 = vadd.xlane.f32.xlu1 %v3222_v39 }
 0x38d   : > { %v1421_v62 = vpop.permute.xlu0 %1420 }
 0x38e   : > { %v1481_v1 = vrot.slane %v1421_v62, %v2887_v4  ;;  %v1139_v62 = vadd.f32 %v3305_v18, %v3236_v54 }
 0x390   : > { %v1520_v24 = vsel %vm1506_vm1, %v1481_v1, %v1477_v30  ;;  %v1542_v1 = vadd.f32 %v3253_v61, %v1140_v46 }
 0x391   : > { %v1424_v51 = vpop.permute.xlu0 %1423 }
 0x392   : > { %v1485_v29 = vrot.slane %v1424_v51, %v2887_v4  ;;  %v1141_v51 = vadd.f32 %v3305_v18, %v3243_v63 }
 0x394   : > { %v1521_v59 = vsel %vm1508_vm2, %v1485_v29, %v1520_v24  ;;  %v1541_v29 = vadd.f32 %v3247_v13, %v1139_v62  ;;  %v1543_v63 = vadd.f32 %v3259_v8, %v1141_v51 }
 0x399   : > { %v1427_v45 = vpop.permute.xlu1 %1426 }
 0x39a   : > { %v1489_v50 = vrot.slane %v1427_v45, %v2887_v4  ;;  %v2462_v45 = vpop.eup %2461 }
 0x39c   : > { %v1522_v58 = vsel %vm1510_vm3, %v1489_v50, %v1521_v59 }
 0x39d   : > { %v1430_v42 = vpop.permute.xlu0 %1429 }
 0x39e   : > { %v1493_v47 = vrot.slane %v1430_v42, %v2887_v4  ;;  %v1142_v42 = vadd.f32 %v3305_v18, %v3256_v5  ;;  %v1146_v5 = vadd.f32 %v3305_v18, %v3279_v19 }
 0x3a0   : > { %v1523_v60 = vsel %vm1512_vm4, %v1493_v47, %v1522_v58  ;;  %v1548_v28 = vadd.f32 %v3283_v6, %v1146_v5 }
 0x3a5   : > { %v1433_v11 = vpop.permute.xlu0 %1432 }
 0x3a6   : > { %v1497_v39 = vrot.slane %v1433_v11, %v2887_v4  ;;  %v1143_v11 = vadd.f32 %v3305_v18, %v3251_v16  ;;  %v1544_v16 = vadd.f32 %v3263_v12, %v1142_v42 }
 0x3a8   : > { %v1524_v2 = vsel %vm1514_vm5, %v1497_v39, %v1523_v60  ;;  %v1545_v30 = vadd.f32 %v3269_v7, %v1143_v11 }
 0x3a9   : > { %v1436_v53 = vpop.permute.xlu0 %1435 }
 0x3aa   : > { %v1501_v20 = vrot.slane %v1436_v53, %v2887_v4 }
 0x3ac   : > { %v1525_v49 = vsel %vm1516_vm6, %v1501_v20, %v1524_v2 }
 0x3de   : > { %v1439_v41 = vpop.permute.xlu1 %1438 }
 0x3df   : > { %v1505_v38 = vrot.slane %v1439_v41, %v2887_v4  ;;  %v1375_v41 = vpop.xlane.xlu0 %1374 }
 0x3e0   : > { %v1536_v2 = vmax.f32 %v1375_v41, 1.0 }
 0x3e1   : > { %v1526_v3 = vsel %vm1518_vm7, %v1505_v38, %v1525_v49  ;;  %v1147_v49 = vadd.f32 %v3305_v18, %v3293_v31 }
 0x3e2   : > { %v1532_v55 = vsel %vm1369_vm8, %v1526_v3, 0.0  ;;  %2463 = vrcp.f32 %v1536_v2 }
 0x3e3   : > { %1533 = vadd.xlane.f32.xlu0 %v1532_v55  ;;  %v1549_v34 = vadd.f32 %v3290_v32, %v1147_v49 }
 0x3e7   : > { %2069 = vadd.xlane.f32.xlu0 %v3189_v15  ;;  %v1144_v15 = vadd.f32 %v3305_v18, %v3266_v14 }
 0x3e9   : > { %v1546_v14 = vadd.f32 %v3273_v9, %v1144_v15 }
 0x3ec   : > { %v2464_v38 = vpop.eup %2463 }
 0x413   : > { %v1531_v0 = vpop.xlane.xlu1 %1530 }
 0x414   : > { %v1538_v54 = vmul.f32 %v2462_v45, %v1531_v0 }
 0x416   : > { %v1566_v50 = vrot.slane %v1538_v54, %v2904_v25  ;;  %v1562_v61 = vrot.slane %v1538_v54, %v2898_v22  ;;  %v1570_v53 = vrot.slane %v1538_v54, %v2901_v23  ;;  %v1574_v13 = vrot.slane %v1538_v54, %v2908_v27 }
 0x417   : > { %v1578_v8 = vrot.slane %v1538_v54, %v2922_v35  ;;  %v1582_v19 = vrot.slane %v1538_v54, %v2929_v40  ;;  %v1586_v12 = vrot.slane %v1538_v54, %v2939_v48  ;;  %v1590_v7 = vrot.slane %v1538_v54, %v2946_v52  ;;  %v2073_v18 = vpop.xlane.xlu1 %2072 }
 0x418   : > { %v1640_v47 = vsub.f32 %v1542_v1, %v1566_v50  ;;  %v1639_v9 = vsub.f32 %v1541_v29, %v1562_v61  ;;  %v1641_v24 = vsub.f32 %v1543_v63, %v1570_v53  ;;  %v1642_v39 = vsub.f32 %v1544_v16, %v1574_v13 }
 0x419   : > { %v1643_v59 = vsub.f32 %v1545_v30, %v1578_v8  ;;  %v1644_v20 = vsub.f32 %v1546_v14, %v1582_v19  ;;  %v1645_v58 = vsub.f32 %v1547_v26, %v1586_v12  ;;  %v1646_v60 = vsub.f32 %v1548_v28, %v1590_v7 }
 0x41a   : > { %1677 = vperm.xlu1 %2459, %v1640_v47   ;;  %1674 = vperm.xlu0 %2460, %v1639_v9  }
 0x41e   : > { %1680 = vperm.xlu1 %2459, %v1641_v24   ;;  %1683 = vperm.xlu0 %2460, %v1642_v39  }
 0x422   : > { %1686 = vperm.xlu0 %2460, %v1643_v59  }
 0x426   : > { %1689 = vperm.xlu0 %2460, %v1644_v20  }
 0x42a   : > { %1692 = vperm.xlu0 %2460, %v1645_v58  }
 0x470   : > { %v1534_v6 = vpop.xlane.xlu0 %1533 }
 0x471   : > { %v1540_v3 = vmul.f32 %v2464_v38, %v1534_v6 }
 0x473   : > { %v1598_v55 = vrot.slane %v1540_v3, %v2904_v25  ;;  %v1594_v46 = vrot.slane %v1540_v3, %v2898_v22  ;;  %v1602_v42 = vrot.slane %v1540_v3, %v2901_v23  ;;  %v1622_v15 = vrot.slane %v1540_v3, %v2946_v52  ;;  %v2467_v23 = vld [vmem:[%s3486_s5 + $0x6] ss:$0 sm:$0xff] }
 0x474   : > { %v1606_v31 = vrot.slane %v1540_v3, %v2908_v27  ;;  %v1610_v22 = vrot.slane %v1540_v3, %v2922_v35  ;;  %v1614_v27 = vrot.slane %v1540_v3, %v2929_v40 }
 0x475   : > { %v1648_v62 = vsub.f32 %v3313_v33, %v1598_v55  ;;  %v1647_v51 = vsub.f32 %v1549_v34, %v1594_v46  ;;  %v1649_v11 = vsub.f32 %v3320_v43, %v1602_v42  ;;  %v1654_v25 = vsub.f32 %v3332_v10, %v1622_v15  ;;  %v2070_v10 = vpop.xlane.xlu0 %2069 }
 0x476   : > { %v1650_v32 = vsub.f32 %v3322_v44, %v1606_v31  ;;  %v2075_v33 = vadd.f32 %v2467_v23, %v2073_v18  ;;  %v1651_v52 = vsub.f32 %v3324_v57, %v1610_v22  ;;  %v1652_v43 = vsub.f32 %v3326_v37, %v1614_v27 }
 0x477   : > { %1701 = vperm.xlu0 %2460, %v1648_v62   ;;  %1698 = vperm.xlu1 %2459, %v1647_v51   ;;  %v1618_v44 = vrot.slane %v1540_v3, %v2939_v48  ;;  %v2074_v17 = vadd.f32 %v2467_v23, %v2070_v10 }
 0x479   : > { %v1653_v35 = vsub.f32 %v3328_v36, %v1618_v44 }
 0x47b   : > { %1695 = vperm.xlu0 %2460, %v1646_v60   ;;  %1704 = vperm.xlu1 %2459, %v1649_v11  }
 0x47f   : > { %1719 = vperm.xlu0 %2460, %v1654_v25   ;;  %1707 = vperm.xlu1 %2459, %v1650_v32  }
 0x483   : > { %2080 = vrot.lane.b32.xlu0 %v2075_v33, %s2637_s29  ;;  %1710 = vperm.xlu1 %2459, %v1651_v52  }
 0x487   : > { %1713 = vperm.xlu1 %2459, %v1652_v43  }
 0x48b   : > { %1716 = vperm.xlu1 %2459, %v1653_v35  }
 0x48f   : > { %2078 = vrot.lane.b32.xlu1 %v2074_v17, %s2637_s29 }
 0x499   : > { %v1675_v45 = vpop.permute.xlu0 %1674  ;;  %v1678_v57 = vpop.permute.xlu1 %1677 }
 0x49a   : > { %v1728_v29 = vrot.slane %v1678_v57, %v2887_v4  ;;  %v1724_v63 = vrot.slane %v1675_v45, %v2887_v4 }
 0x49c   : > { %v1785_v5 = vsel %vm1506_vm1, %v1728_v29, %v1724_v63 }
 0x49d   : > { %v1684_v0 = vpop.permute.xlu0 %1683  ;;  %v1681_v40 = vpop.permute.xlu1 %1680 }
 0x49e   : > { %v1732_v37 = vrot.slane %v1681_v40, %v2887_v4  ;;  %v1736_v36 = vrot.slane %v1684_v0, %v2887_v4 }
 0x4a0   : > { %v1786_v16 = vsel %vm1508_vm2, %v1732_v37, %v1785_v5 }
 0x4a1   : > { %v1687_v1 = vpop.permute.xlu0 %1686  ;;  %v1787_v53 = vsel %vm1510_vm3, %v1736_v36, %v1786_v16 }
 0x4a2   : > { %v1740_v30 = vrot.slane %v1687_v1, %v2887_v4 }
 0x4a4   : > { %v1788_v13 = vsel %vm1512_vm4, %v1740_v30, %v1787_v53 }
 0x4a5   : > { %v1690_v54 = vpop.permute.xlu0 %1689 }
 0x4a6   : > { %v1744_v50 = vrot.slane %v1690_v54, %v2887_v4 }
 0x4a8   : > { %v1789_v12 = vsel %vm1514_vm5, %v1744_v50, %v1788_v13 }
 0x4a9   : > { %v1693_v48 = vpop.permute.xlu0 %1692 }
 0x4aa   : > { %v1748_v61 = vrot.slane %v1693_v48, %v2887_v4 }
 0x4ac   : > { %v1790_v47 = vsel %vm1516_vm6, %v1748_v61, %v1789_v12 }
 0x4f6   : > { %v1699_v14 = vpop.permute.xlu1 %1698  ;;  %v1702_v26 = vpop.permute.xlu0 %1701 }
 0x4f7   : > { %v1756_v59 = vrot.slane %v1699_v14, %v2887_v4  ;;  %v1760_v56 = vrot.slane %v1702_v26, %v2887_v4 }
 0x4f9   : > { %v1792_v2 = vsel %vm1506_vm1, %v1760_v56, %v1756_v59 }
 0x4fa   : > { %v1705_v8 = vpop.permute.xlu1 %1704  ;;  %v1696_v19 = vpop.permute.xlu0 %1695 }
 0x4fb   : > { %v1752_v7 = vrot.slane %v1696_v19, %v2887_v4  ;;  %v1764_v20 = vrot.slane %v1705_v8, %v2887_v4 }
 0x4fd   : > { %v1791_v9 = vsel %vm1518_vm7, %v1752_v7, %v1790_v47  ;;  %v1793_v49 = vsel %vm1508_vm2, %v1764_v20, %v1792_v2 }
 0x4fe   : > { %v1801_v24 = vsel %vm1655_vm9, %v1791_v9, -inf  ;;  %v1708_v28 = vpop.permute.xlu1 %1707  ;;  %v1720_v6 = vpop.permute.xlu0 %1719 }
 0x4ff   : > { %1803 = vst.msk [vmem:[%s3441_s9] sm:$0xff] %vm1369_vm8, %v1801_v24  ;;  %v1768_v58 = vrot.slane %v1708_v28, %v2887_v4  ;;  %v1784_v62 = vrot.slane %v1720_v6, %v2887_v4 }
 0x501   : > { %v1794_v3 = vsel %vm1510_vm3, %v1768_v58, %v1793_v49 }
 0x502   : > { %v1711_v39 = vpop.permute.xlu1 %1710  ;;  %v2081_v31 = vpop.permute.xlu0 %2080 }
 0x503   : > { %v1772_v41 = vrot.slane %v1711_v39, %v2887_v4  ;;  %2086 = vst.msk [vmem:[%s379_s18 + $0x8] sm:$0xff] %vm2084_vm11, %v2081_v31 }
 0x505   : > { %v1795_v34 = vsel %vm1512_vm4, %v1772_v41, %v1794_v3 }
 0x506   : > { %v1714_v60 = vpop.permute.xlu1 %1713 }
 0x507   : > { %v1776_v38 = vrot.slane %v1714_v60, %v2887_v4 }
 0x509   : > { %v1796_v51 = vsel %vm1514_vm5, %v1776_v38, %v1795_v34 }
 0x50a   : > { %v1717_v55 = vpop.permute.xlu1 %1716 }
 0x50b   : > { %v1780_v46 = vrot.slane %v1717_v55, %v2887_v4 }
 0x50d   : > { %v1797_v42 = vsel %vm1516_vm6, %v1780_v46, %v1796_v51 }
 0x50e   : > { %v1798_v11 = vsel %vm1518_vm7, %v1784_v62, %v1797_v42  ;;  %v2079_v15 = vpop.permute.xlu1 %2078 }
 0x50f   : > { %v1802_v25 = vsel %vm1656_vm10, %v1798_v11, -inf  ;;  %2085 = vst.msk [vmem:[%s379_s18] sm:$0xff] %vm2084_vm11, %v2079_v15 }
 0x510   : > { %1804 = vst.msk [vmem:[%s3441_s9 + $0x8] sm:$0xff] %vm1369_vm8, %v1802_v25 }
 0x511 PF: > { %p20_p11 = scmp.ge.s32.totalorder %s2811_s21, 4   ;;  %s3502_s24 = smov %s2616_s25 }
 0x512   : > { %s3503_s25 = smov %s2620_s26  ;;  %s3504_s26 = smov %s2821_s17 }
 0x513   : > { %s3505_s27 = smov %s2811_s21  ;;  %22 = sbr.rel (!%p20_p11) target bundleno = 5 (0x5), region = 114 }
 0x51a   :  { %2126 = vsyncpa [#allocation3], 1 }
 0x51b   :  { %2128 = vsyncpa [#allocation3 + $0x1], 1 }
 0x51c   :  { %2129 = vsyncpa [#allocation5], 1 }
 0x51d   :  { %2130 = vsyncpa [#allocation8], 1 }

</bundles_post_ra>
